<compile_context>
chip_gen: v5e
topology: v5e:2x2
jax: 0.10.0
libtpu: 0.0.40
codegen_flags: <defaults>
</compile_context>

<pallas_src>
import functools

import jax
import jax.numpy as jnp
from jax import lax
from jax.experimental import pallas as pl
from jax.experimental.pallas import tpu as pltpu


# ----------------------------- Pallas kernels ------------------------------

def _conv_stats_kernel(x_ref, w_ref, y_ref, psum_ref, psq_ref,
                       *, kh, kw, h, w, cin, kpad):
    """One image per grid step.

    Conv2d(kh x kw, stride 1, 'SAME', no bias) as ONE matmul with contraction
    K = kh*kw*cin (zero-padded to kpad), producing the output directly in
    channels-first (Cout, H*W) layout.  Per-channel BatchNorm partial
    statistics (sum, sum of squares) are fused into the same pass.
    """
    hw = h * w
    k = kh * kw * cin

    xb = x_ref[0]                                        # (h+2p, w+2p, cin) NHWC halo
    cols = []
    for t in range(kh * kw):
        i, j = divmod(t, kw)
        cols.append(xb[i:i + h, j:j + w, :].reshape(hw, cin))   # shifted window
    if kpad > k:
        cols.append(jnp.zeros((hw, kpad - k), jnp.float32))     # pad K to mult. of 8
    patches = jnp.concatenate(cols, axis=1)              # (hw, kpad) im2col, VMEM only

    # single matmul, accumulation stays in registers/MRB (no y_ref RMW);
    # 'ok,pk->op' contracts both last dims and yields (cout, hw) = NCHW layout.
    acc = jnp.einsum('ok,pk->op', w_ref[...], patches,
                     preferred_element_type=jnp.float32)  # (cout, hw)
    y_ref[...] = acc[None]                                # written exactly once

    s = jnp.sum(acc, axis=1, keepdims=True)               # (cout, 1) partial sum
    sq = jnp.sum(acc * acc, axis=1, keepdims=True)        # (cout, 1) partial sumsq
    psum_ref[...] = jnp.broadcast_to(s[None], psum_ref.shape)
    psq_ref[...] = jnp.broadcast_to(sq[None], psq_ref.shape)


def _bn_relu_kernel(y_ref, scale_ref, shift_ref, o_ref):
    # fused batchnorm (precomputed per-channel scale/shift) + ReLU
    # y_ref: (1, cout, hw), scale/shift: (cout, 1) broadcast over lanes
    o_ref[...] = jnp.maximum(y_ref[...] * scale_ref[...] + shift_ref[...], 0.0)


# ------------------------------ JAX wrapper ---------------------------------

def bn_module_forward(x_nchw, weight, bias, gamma, beta, *, eps=1e-5):
    """BNModule.forward: relu(BatchNorm2d(Conv2d(x))) with batch statistics."""
    del bias  # per-channel conv bias cancels exactly under training-mode BN
    n, cin, h, w = x_nchw.shape
    cout, _, kh, kw = weight.shape
    pad = kh // 2
    hp, wp = h + 2 * pad, w + 2 * pad
    hw = h * w
    m = n * hw
    k = kh * kw * cin
    kpad = ((k + 7) // 8) * 8

    # TODO(synk): row-tile the image (grid (n, h//th) with halo rows) so the
    # per-step blocks fit the 16/32 MiB scoped-VMEM defaults for large H*W and
    # give v7x's two TensorCores more than n parallel grid points; switch the
    # stats to per-tile centered (Welford-style) partials for large m.

    # NCHW -> NHWC + spatial halo pad for the input only (x is the small tensor);
    # all output-side layout work happens inside the kernels.
    x_nhwc = jnp.transpose(x_nchw, (0, 2, 3, 1)).astype(jnp.float32)
    x_pad = jnp.pad(x_nhwc, ((0, 0), (pad, pad), (pad, pad), (0, 0)))

    # weight [Cout, Cin, KH, KW] -> [Cout, Kpad], K ordered tap-major / cin-minor
    # to match the kernel's im2col column order, zero-padded to a multiple of 8.
    w2 = jnp.transpose(weight.astype(jnp.float32), (0, 2, 3, 1)).reshape(cout, k)
    w2 = jnp.pad(w2, ((0, 0), (0, kpad - k)))

    conv_kernel = functools.partial(_conv_stats_kernel,
                                    kh=kh, kw=kw, h=h, w=w, cin=cin, kpad=kpad)

    # ---- 1) conv (single matmul) + fused per-image channel partial stats ----
    y, psum, psq = pl.pallas_call(
        conv_kernel,
        out_shape=(
            jax.ShapeDtypeStruct((n, cout, hw), jnp.float32),   # unpadded, lane-dense
            jax.ShapeDtypeStruct((n, cout, 128), jnp.float32),
            jax.ShapeDtypeStruct((n, cout, 128), jnp.float32),
        ),
        grid_spec=pltpu.PrefetchScalarGridSpec(
            num_scalar_prefetch=0,
            grid=(n,),
            in_specs=[
                pl.BlockSpec((1, hp, wp, cin), lambda i: (i, 0, 0, 0)),
                pl.BlockSpec((cout, kpad), lambda i: (0, 0)),
            ],
            out_specs=(
                pl.BlockSpec((1, cout, hw), lambda i: (i, 0, 0)),
                pl.BlockSpec((1, cout, 128), lambda i: (i, 0, 0)),
                pl.BlockSpec((1, cout, 128), lambda i: (i, 0, 0)),
            ),
        ),
        compiler_params=pltpu.CompilerParams(
            dimension_semantics=("parallel",)),
    )(x_pad, w2)

    # ---- 2) finalize BN statistics (tiny (Cout,)-sized math in jnp) ----
    ch_sum = jnp.sum(psum[:, :, 0], axis=0)              # (cout,)
    ch_sq = jnp.sum(psq[:, :, 0], axis=0)
    mean = ch_sum / m
    var = jnp.maximum(ch_sq / m - mean * mean, 0.0)      # biased var, clamped >= 0
    inv_std = lax.rsqrt(var + eps)
    g = gamma.astype(jnp.float32) * inv_std
    scale = g.reshape(cout, 1)
    shift = (beta.astype(jnp.float32) - mean * g).reshape(cout, 1)

    # ---- 3) fused BN + ReLU over lane-dense (1, Cout, H*W) blocks ----
    out3 = pl.pallas_call(
        _bn_relu_kernel,
        out_shape=jax.ShapeDtypeStruct((n, cout, hw), jnp.float32),
        grid_spec=pltpu.PrefetchScalarGridSpec(
            num_scalar_prefetch=0,
            grid=(n,),
            in_specs=[
                pl.BlockSpec((1, cout, hw), lambda i: (i, 0, 0)),
                pl.BlockSpec((cout, 1), lambda i: (0, 0)),
                pl.BlockSpec((cout, 1), lambda i: (0, 0)),
            ],
            out_specs=pl.BlockSpec((1, cout, hw), lambda i: (i, 0, 0)),
        ),
        compiler_params=pltpu.CompilerParams(
            dimension_semantics=("parallel",)),
    )(y, scale, shift)

    return out3.reshape(n, cout, h, w)                    # already channels-first


# ------------------------------ reference -----------------------------------

def _reference(x_nchw, weight, bias, gamma, beta, eps=1e-5):
    y = lax.conv_general_dilated(
        x_nchw.astype(jnp.float32), weight.astype(jnp.float32),
        window_strides=(1, 1), padding="SAME",
        dimension_numbers=("NCHW", "OIHW", "NCHW"),
    ) + bias.reshape(1, -1, 1, 1)
    mean = jnp.mean(y, axis=(0, 2, 3), keepdims=True)
    var = jnp.mean((y - mean) ** 2, axis=(0, 2, 3), keepdims=True)  # biased
    yhat = (y - mean) * lax.rsqrt(var + eps)
    return jnp.maximum(yhat * gamma.reshape(1, -1, 1, 1)
                       + beta.reshape(1, -1, 1, 1), 0.0)


# -------------------------------- main ---------------------------------------

if __name__ == "__main__":
    key = jax.random.PRNGKey(0)
    k_x, k_w, k_b = jax.random.split(key, 3)

    N, Cin, H, W = 2, 4, 16, 16
    Cout, KH, KW = 8, 3, 3

    x = jax.random.normal(k_x, (N, Cin, H, W), dtype=jnp.float32)

    # deterministic synthetic parameters (Conv2d-shaped weight/bias,
    # BatchNorm2d default affine params gamma=1, beta=0)
    weight = 0.1 * jax.random.normal(k_w, (Cout, Cin, KH, KW), dtype=jnp.float32)
    bias = 0.05 * jax.random.normal(k_b, (Cout,), dtype=jnp.float32)
    gamma = jnp.ones((Cout,), dtype=jnp.float32)
    beta = jnp.zeros((Cout,), dtype=jnp.float32)

    out = bn_module_forward(x, weight, bias, gamma, beta)
    out = jax.block_until_ready(out)

    ref = _reference(x, weight, bias, gamma, beta)
    assert out.shape == (N, Cout, H, W)
    assert jnp.max(jnp.abs(out - ref)) < 1e-4, "mismatch vs reference"

    print("KERNEL_OK")
</pallas_src>

<mosaic_0001>
module attributes {stable_mosaic.version = 11 : i64} {
  func.func @_conv_stats_kernel(%arg0: i32, %arg1: memref<1x18x18x4xf32, #tpu.memory_space<vmem>>, %arg2: memref<8x40xf32, #tpu.memory_space<vmem>>, %arg3: memref<1x8x256xf32, #tpu.memory_space<vmem>>, %arg4: memref<1x8x128xf32, #tpu.memory_space<vmem>>, %arg5: memref<1x8x128xf32, #tpu.memory_space<vmem>>) attributes {dimension_semantics = [#tpu.dimension_semantics<parallel>], iteration_bounds = array<i64: 2>, scalar_prefetch = 0 : i64, scratch_operands = 0 : i64, tpu.core_type = #tpu.core_type<tc>, window_params = [{transform_indices = @transform_0, window_bounds = array<i64: 1, 18, 18, 4>}, {pipeline_mode = #tpu.pipeline_mode<synchronous>, transform_indices = @transform_1, window_bounds = array<i64: 8, 40>}, {transform_indices = @transform_2, window_bounds = array<i64: 1, 8, 256>}, {transform_indices = @transform_3, window_bounds = array<i64: 1, 8, 128>}, {transform_indices = @transform_4, window_bounds = array<i64: 1, 8, 128>}]} {
    %c0 = arith.constant 0 : index
    %c0_0 = arith.constant 0 : index
    %c0_1 = arith.constant 0 : index
    %c0_2 = arith.constant 0 : index
    %0 = vector.load %arg1[%c0, %c0_0, %c0_1, %c0_2] : memref<1x18x18x4xf32, #tpu.memory_space<vmem>>, vector<1x18x18x4xf32>
    %1 = vector.shape_cast %0 : vector<1x18x18x4xf32> to vector<18x18x4xf32>
    %2 = vector.extract_strided_slice %1 {offsets = [0, 0, 0], sizes = [16, 16, 4], strides = [1, 1, 1]} : vector<18x18x4xf32> to vector<16x16x4xf32>
    %3 = vector.shape_cast %2 : vector<16x16x4xf32> to vector<256x4xf32>
    %4 = vector.extract_strided_slice %1 {offsets = [0, 1, 0], sizes = [16, 16, 4], strides = [1, 1, 1]} : vector<18x18x4xf32> to vector<16x16x4xf32>
    %5 = vector.shape_cast %4 : vector<16x16x4xf32> to vector<256x4xf32>
    %6 = vector.extract_strided_slice %1 {offsets = [0, 2, 0], sizes = [16, 16, 4], strides = [1, 1, 1]} : vector<18x18x4xf32> to vector<16x16x4xf32>
    %7 = vector.shape_cast %6 : vector<16x16x4xf32> to vector<256x4xf32>
    %8 = vector.extract_strided_slice %1 {offsets = [1, 0, 0], sizes = [16, 16, 4], strides = [1, 1, 1]} : vector<18x18x4xf32> to vector<16x16x4xf32>
    %9 = vector.shape_cast %8 : vector<16x16x4xf32> to vector<256x4xf32>
    %10 = vector.extract_strided_slice %1 {offsets = [1, 1, 0], sizes = [16, 16, 4], strides = [1, 1, 1]} : vector<18x18x4xf32> to vector<16x16x4xf32>
    %11 = vector.shape_cast %10 : vector<16x16x4xf32> to vector<256x4xf32>
    %12 = vector.extract_strided_slice %1 {offsets = [1, 2, 0], sizes = [16, 16, 4], strides = [1, 1, 1]} : vector<18x18x4xf32> to vector<16x16x4xf32>
    %13 = vector.shape_cast %12 : vector<16x16x4xf32> to vector<256x4xf32>
    %14 = vector.extract_strided_slice %1 {offsets = [2, 0, 0], sizes = [16, 16, 4], strides = [1, 1, 1]} : vector<18x18x4xf32> to vector<16x16x4xf32>
    %15 = vector.shape_cast %14 : vector<16x16x4xf32> to vector<256x4xf32>
    %16 = vector.extract_strided_slice %1 {offsets = [2, 1, 0], sizes = [16, 16, 4], strides = [1, 1, 1]} : vector<18x18x4xf32> to vector<16x16x4xf32>
    %17 = vector.shape_cast %16 : vector<16x16x4xf32> to vector<256x4xf32>
    %18 = vector.extract_strided_slice %1 {offsets = [2, 2, 0], sizes = [16, 16, 4], strides = [1, 1, 1]} : vector<18x18x4xf32> to vector<16x16x4xf32>
    %19 = vector.shape_cast %18 : vector<16x16x4xf32> to vector<256x4xf32>
    %cst = arith.constant 0.000000e+00 : f32
    %20 = vector.broadcast %cst : f32 to vector<256x4xf32>
    %21 = tpu.concatenate %3, %5, %7, %9, %11, %13, %15, %17, %19, %20 in 1 : vector<256x4xf32>, vector<256x4xf32>, vector<256x4xf32>, vector<256x4xf32>, vector<256x4xf32>, vector<256x4xf32>, vector<256x4xf32>, vector<256x4xf32>, vector<256x4xf32>, vector<256x4xf32> -> vector<256x40xf32>
    %c0_3 = arith.constant 0 : index
    %c0_4 = arith.constant 0 : index
    %22 = vector.load %arg2[%c0_3, %c0_4] : memref<8x40xf32, #tpu.memory_space<vmem>>, vector<8x40xf32>
    "tpu.trace_start"() <{level = 10 : i32, message = "ok,pk->op"}> : () -> ()
    %cst_5 = arith.constant dense<0.000000e+00> : vector<8x256xf32>
    %23 = tpu.matmul %22, %21, %cst_5 {dimension_numbers = #tpu.dot_dimension_numbers<[1], [1], [0], [0], [0, 0, 1, 0], [], []>} : vector<8x40xf32>, vector<256x40xf32>, vector<8x256xf32> -> vector<8x256xf32>
    "tpu.trace_stop"() : () -> ()
    %24 = vector.shape_cast %23 : vector<8x256xf32> to vector<1x8x256xf32>
    %c0_6 = arith.constant 0 : index
    %c0_7 = arith.constant 0 : index
    %c0_8 = arith.constant 0 : index
    %25 = vector.load %arg3[%c0_6, %c0_7, %c0_8] : memref<1x8x256xf32, #tpu.memory_space<vmem>>, vector<1x8x256xf32>
    tpu.vector_store %arg3[%c0_6, %c0_7, %c0_8], %24 {strides = array<i32>} : memref<1x8x256xf32, #tpu.memory_space<vmem>>, vector<1x8x256xf32>,
    %cst_9 = arith.constant dense<0.000000e+00> : vector<8xf32>
    %26 = vector.multi_reduction <add>, %23, %cst_9 [1] : vector<8x256xf32> to vector<8xf32>
    %27 = vector.shape_cast %26 : vector<8xf32> to vector<8x1xf32>
    %28 = arith.mulf %23, %23 : vector<8x256xf32>
    %cst_10 = arith.constant dense<0.000000e+00> : vector<8xf32>
    %29 = vector.multi_reduction <add>, %28, %cst_10 [1] : vector<8x256xf32> to vector<8xf32>
    %30 = vector.shape_cast %29 : vector<8xf32> to vector<8x1xf32>
    %31 = vector.shape_cast %27 : vector<8x1xf32> to vector<1x8x1xf32>
    %32 = vector.shape_cast %31 : vector<1x8x1xf32> to vector<1x8x1xf32>
    %33 = vector.broadcast %32 : vector<1x8x1xf32> to vector<1x8x128xf32>
    %c0_11 = arith.constant 0 : index
    %c0_12 = arith.constant 0 : index
    %c0_13 = arith.constant 0 : index
    %34 = vector.load %arg4[%c0_11, %c0_12, %c0_13] : memref<1x8x128xf32, #tpu.memory_space<vmem>>, vector<1x8x128xf32>
    tpu.vector_store %arg4[%c0_11, %c0_12, %c0_13], %33 {strides = array<i32>} : memref<1x8x128xf32, #tpu.memory_space<vmem>>, vector<1x8x128xf32>,
    %35 = vector.shape_cast %30 : vector<8x1xf32> to vector<1x8x1xf32>
    %36 = vector.shape_cast %35 : vector<1x8x1xf32> to vector<1x8x1xf32>
    %37 = vector.broadcast %36 : vector<1x8x1xf32> to vector<1x8x128xf32>
    %c0_14 = arith.constant 0 : index
    %c0_15 = arith.constant 0 : index
    %c0_16 = arith.constant 0 : index
    %38 = vector.load %arg5[%c0_14, %c0_15, %c0_16] : memref<1x8x128xf32, #tpu.memory_space<vmem>>, vector<1x8x128xf32>
    tpu.vector_store %arg5[%c0_14, %c0_15, %c0_16], %37 {strides = array<i32>} : memref<1x8x128xf32, #tpu.memory_space<vmem>>, vector<1x8x128xf32>,
    return
  }
  func.func @transform_0(%arg0: i32) -> (i32, i32, i32, i32) {
    %c0_i32 = arith.constant 0 : i32
    %c0_i32_0 = arith.constant 0 : i32
    %c0_i32_1 = arith.constant 0 : i32
    %c0_i32_2 = arith.constant 0 : i32
    return %arg0, %c0_i32, %c0_i32_0, %c0_i32_1 : i32, i32, i32, i32
  }
  func.func @transform_1(%arg0: i32) -> (i32, i32) {
    %c0_i32 = arith.constant 0 : i32
    %c0_i32_0 = arith.constant 0 : i32
    %c0_i32_1 = arith.constant 0 : i32
    return %c0_i32, %c0_i32_0 : i32, i32
  }
  func.func @transform_2(%arg0: i32) -> (i32, i32, i32) {
    %c0_i32 = arith.constant 0 : i32
    %c0_i32_0 = arith.constant 0 : i32
    %c0_i32_1 = arith.constant 0 : i32
    return %arg0, %c0_i32, %c0_i32_0 : i32, i32, i32
  }
  func.func @transform_3(%arg0: i32) -> (i32, i32, i32) {
    %c0_i32 = arith.constant 0 : i32
    %c0_i32_0 = arith.constant 0 : i32
    %c0_i32_1 = arith.constant 0 : i32
    return %arg0, %c0_i32, %c0_i32_0 : i32, i32, i32
  }
  func.func @transform_4(%arg0: i32) -> (i32, i32, i32) {
    %c0_i32 = arith.constant 0 : i32
    %c0_i32_0 = arith.constant 0 : i32
    %c0_i32_1 = arith.constant 0 : i32
    return %arg0, %c0_i32, %c0_i32_0 : i32, i32, i32
  }
}

</mosaic_0001>

<bundles_post_ra>
// kernel: tpu_custom_call.1
= control target key start
LH: loop header
LB: loop body
LE: loop exit
PB: predicated region body
PF: predicated region fallthrough
CT: control target
= control target key end

     0   :  { %10 = vsyncpa [#allocation3], 0  ;;  %s4210_s0 = inlined_call_operand.vmem [shape: f32[2,18,18,4], index: 0, kind: input, shape index: {}]   ;;  %s4211_s1 = inlined_call_operand.vmem [shape: f32[8,40], index: 1, kind: input, shape index: {}]   ;;  %s4212_s2 = inlined_call_operand.hbm [shape: f32[2,8,256], index: 2, kind: output, shape index: {0}]   ;;  %s4213_s3 = inlined_call_operand.hbm [shape: f32[2,8,128], index: 3, kind: output, shape index: {1}]   ;;  %s4214_s4 = inlined_call_operand.hbm [shape: f32[2,8,128], index: 4, kind: output, shape index: {2}]  }
   0x1   :  { %12 = vsyncpa [#allocation3 + $0x1], 0 }
   0x2   :  { %13 = vsyncpa [#allocation5], 0 }
   0x3   :  { %15 = vsyncpa [#allocation5 + $0x1], 0  ;;  %s2197_s15 = smov 0   ;;  %s2199_s16 = smov 0  }
   0x4   :  { %s2201_s17 = smov 0   ;;  %s2203_s18 = smov 0  }
   0x5 LB: > { %s2218_s19 = sadd.s32 4294967295, %s2162_s18   ;;  %s1899_s20 = sadd.s32 4294967294, %s2162_s18   ;;  %s2162_s18 = sphi %s2203_s18, %s4644_s18   ;;  %s2158_s17 = sphi %s2201_s17, %s4643_s17   ;;  %s2154_s16 = sphi %s2199_s16, %s4642_s16   ;;  %s2150_s15 = sphi %s2197_s15, %s4641_s15  }
   0x6   : > { %s2222_s21 = sadd.s32 1, %s2162_s18   ;;  %s75_s22 = sadd.s32 1, %s2158_s17 }
   0x7   : > { %s72_s23 = ssub.s32 %s2162_s18, %s2222_s21  ;;  %p85_p0 = scmp.ne.s32.totalorder %s2158_s17, %s2154_s16 }
   0x8   : > { %p73_p1 = scmp.eq.s32.totalorder %s72_s23, 0  ;;  %p86_p2 = scmp.eq.s32.totalorder %s2218_s19, 1 }
   0x9   : > { %p91_p3 = scmp.ne.s32.totalorder %s2154_s16, %s2150_s15  ;;  %p92_p4 = scmp.eq.s32.totalorder %s1899_s20, 1 }
   0xa   : > { %s2235_s24 = scalar_select %p73_p1, %s2158_s17, %s75_s22  }
   0xb   : > { %p2237_p5 = por %p86_p2, %p85_p0  ;;  %p2241_p6 = por %p92_p4, %p91_p3 }
   0xc   : > { %p1902_p7 = scmp.ge.s32.totalorder %s2162_s18, 1  ;;  %p173_p8 = scmp.lt.s32.totalorder %s2162_s18, 3 }
   0xe   : > { %p174_p9 = pnand %p1902_p7, %p173_p8 }
  0x10   : > { %177 = sbr.rel (%p174_p9) target bundleno = 1093 (0x445), region = 28 }
  0x15   : > { %p209_p10 = scmp.lt.s32.totalorder %s2218_s19, 1  ;;  %vm316_vm0 = vcmask 1046528   ;;  %s2164_s6 = smov 4   ;;  %vm397_vm1 = vcmask 1045504   ;;  %vm1272_vm2 = vcmask 31744   ;;  %vm1305_vm3 = vcmask 64512  }
  0x16   : > { %s2165_s7 = smov 8   ;;  %s2166_s8 = smov 12   ;;  %vm1338_vm4 = vcmask 97280   ;;  %vm1371_vm5 = vcmask 130048   ;;  %vm1404_vm6 = vcmask 162816   ;;  %vm1437_vm7 = vcmask 195584  }
  0x17   : > { %s210_s27 = scalar_select %p209_p10, %s2218_s19, 1  ;;  %vm1470_vm8 = vcmask 228352   ;;  %vm1503_vm9 = vcmask 261120   ;;  %vm1536_vm10 = vcmask 293888   ;;  %vm1570_vm11 = vcmask 326656  }
  0x18   : > { %s2167_s9 = smov 16   ;;  %s2168_s10 = smov 20  }
  0x19   : > { %s1951_s28 = smul.u32 432, %s210_s27  ;;  %s2169_s11 = smov 24  }
  0x1a   : > { %s2170_s12 = smov 28   ;;  %s2171_s13 = smov 32  }
  0x1b   : > { %s2252_s5 = scalar_lea.vmem %s4210_s0, %s1951_s28  ;;  %s4137_s23 = sand.u32 1, %s2154_s16  }
  0x1c   : > { %v2255_v0 = vld [vmem:[%s2252_s5 + $0x30] sm:$0xff]  ;;  %v2258_v1 = vld [vmem:[%s2252_s5 + $0x38] sm:$0xff]  ;;  %v2266_v5 = vld [vmem:[%s2252_s5 + $0x20] sm:$0xff]  ;;  %s1903_s27 = sshll.u32 %s4137_s23, 4  ;;  %s1950_s29 = sshll.u32 %s2218_s19, 4 }
  0x1d   : > { %v2261_v2 = vld [vmem:[%s2252_s5 + $0x18] sm:$0xff]  ;;  %v327_v3 = vrot.slane %v2255_v0, 1  ;;  %v328_v4 = vrot.slane %v2258_v1, 1  ;;  %v2270_v7 = vld [vmem:[%s2252_s5] sm:$0xff]  ;;  %v2273_v8 = vld [vmem:[%s2252_s5 + $0x8] sm:$0xff]  ;;  %v323_v9 = vrot.slane %v2266_v5, 1 }
  0x1e   : > { %v322_v6 = vrot.slane %v2261_v2, 1  ;;  %v317_v10 = vrot.slane %v2270_v7, 1  ;;  %v318_v11 = vrot.slane %v2273_v8, 1  ;;  %v2279_v12 = vld [vmem:[%s2252_s5 + $0x40] sm:$0x3]  ;;  %v2313_v25 = vld [vmem:[%s2252_s5 + $0x68] sm:$0xff] }
  0x1f   : > { %v2282_v13 = vsel %vm316_vm0, %v327_v3, %v328_v4  ;;  %v2285_v14 = vld [vmem:[%s2252_s5 + $0x28] sm:$0x3]  ;;  %v2288_v15 = vld [vmem:[%s2252_s5 + $0x10] sm:$0x3]  ;;  %v330_v18 = vrot.slane %v2279_v12, 1  ;;  %v2310_v24 = vld [vmem:[%s2252_s5 + $0x60] sm:$0xff] }
  0x20   : > { %4306 = vst [vmem:[#allocation9_spill] sm:$0xff] %v2282_v13  ;;  %512 = vrot.lane.b32.xlu2 %v2282_v13, %s2164_s6  ;;  %v2293_v16 = vsel %vm316_vm0, %v322_v6, %v323_v9  ;;  %v319_v17 = vsel %vm316_vm0, %v317_v10, %v318_v11  ;;  %v325_v19 = vrot.slane %v2285_v14, 1  ;;  %v320_v20 = vrot.slane %v2288_v15, 1  ;;  %v2316_v26 = vld [vmem:[%s2252_s5 + $0x50] sm:$0xff]  ;;  %v2319_v27 = vld [vmem:[%s2252_s5 + $0x58] sm:$0x3] }
  0x21   : > { %508 = vrot.lane.b32.xlu1 %v2293_v16, %s2164_s6  ;;  %504 = vrot.lane.b32.xlu0 %v319_v17, %s2164_s6  ;;  %v2303_v21 = vsel %vm316_vm0, %v328_v4, %v330_v18  ;;  %v2322_v28 = vld [vmem:[%s2252_s5 + $0x48] sm:$0xff]  ;;  %v337_v29 = vrot.slane %v2310_v24, 1  ;;  %v338_v30 = vrot.slane %v2313_v25, 1  ;;  %v333_v31 = vrot.slane %v2316_v26, 1  ;;  %v2344_v37 = vld [vmem:[%s2252_s5 + $0x80] sm:$0xff]  ;;  %s194_s28 = scalar_lea.vmem [#allocation2], %s1903_s27 }
  0x22   : > { %4307 = vst [vmem:[#allocation10_spill] sm:$0xff] %v2303_v21  ;;  %v2306_v22 = vsel %vm316_vm0, %v323_v9, %v325_v19  ;;  %v321_v23 = vsel %vm316_vm0, %v318_v11, %v320_v20  ;;  %v335_v32 = vrot.slane %v2319_v27, 1  ;;  %v332_v33 = vrot.slane %v2322_v28, 1  ;;  %v2347_v38 = vld [vmem:[%s2252_s5 + $0x88] sm:$0x3]  ;;  %v2350_v39 = vld [vmem:[%s2252_s5 + $0x78] sm:$0xff] }
  0x23   : > { %v2335_v34 = vsel %vm316_vm0, %v337_v29, %v338_v30  ;;  %v2353_v40 = vld [vmem:[%s2252_s5 + $0x70] sm:$0x3]  ;;  %v343_v41 = vrot.slane %v2344_v37, 1  ;;  %v345_v42 = vrot.slane %v2347_v38, 1  ;;  %v342_v43 = vrot.slane %v2350_v39, 1  ;;  %v2375_v48 = vld [vmem:[%s2252_s5 + $0xa8] sm:$0xff] }
  0x24   : > { %4308 = vst [vmem:[#allocation11_spill] sm:$0xff] %v2335_v34  ;;  %v2338_v35 = vsel %vm316_vm0, %v333_v31, %v335_v32  ;;  %v2341_v36 = vsel %vm316_vm0, %v332_v33, %v333_v31  ;;  %v340_v44 = vrot.slane %v2353_v40, 1  ;;  %v2378_v49 = vld [vmem:[%s2252_s5 + $0xb0] sm:$0xff]  ;;  %v2381_v50 = vld [vmem:[%s2252_s5 + $0x98] sm:$0xff]  ;;  %v2384_v51 = vld [vmem:[%s2252_s5 + $0xa0] sm:$0x3] }
  0x25   : > { %4309 = vst [vmem:[#allocation12_spill] sm:$0xff] %v2338_v35  ;;  %v2366_v45 = vsel %vm316_vm0, %v343_v41, %v345_v42  ;;  %v2369_v46 = vsel %vm316_vm0, %v342_v43, %v343_v41  ;;  %v2387_v52 = vld [vmem:[%s2252_s5 + $0x90] sm:$0xff]  ;;  %v352_v53 = vrot.slane %v2375_v48, 1  ;;  %v353_v54 = vrot.slane %v2378_v49, 1  ;;  %v2410_v61 = vld [vmem:[%s2252_s5 + $0xc8] sm:$0xff]  ;;  %v2416_v63 = vld [vmem:[%s2252_s5 + $0xc0] sm:$0xff] }
  0x26   : > { %4310 = vst [vmem:[#allocation13_spill] sm:$0xff] %v2341_v36  ;;  %v2372_v47 = vsel %vm316_vm0, %v338_v30, %v340_v44  ;;  %v348_v55 = vrot.slane %v2381_v50, 1  ;;  %v350_v56 = vrot.slane %v2384_v51, 1  ;;  %v347_v57 = vrot.slane %v2387_v52, 1  ;;  %v2413_v62 = vld [vmem:[%s2252_s5 + $0xd0] sm:$0x3] }
  0x27   : > { %4311 = vst [vmem:[#allocation14_spill] sm:$0xff] %v2366_v45  ;;  %v2401_v58 = vsel %vm316_vm0, %v352_v53, %v353_v54  ;;  %v2419_v3 = vld [vmem:[%s2252_s5 + $0xb8] sm:$0x3]  ;;  %v358_v4 = vrot.slane %v2410_v61, 1  ;;  %v360_v6 = vrot.slane %v2413_v62, 1  ;;  %v357_v9 = vrot.slane %v2416_v63, 1 }
  0x28   : > { %514 = vrot.lane.b32.xlu2 %v2303_v21, %s2164_s6  ;;  %4312 = vst [vmem:[#allocation15_spill] sm:$0xff] %v2369_v46  ;;  %v2404_v59 = vsel %vm316_vm0, %v348_v55, %v350_v56  ;;  %v2407_v60 = vsel %vm316_vm0, %v347_v57, %v348_v55  ;;  %v355_v10 = vrot.slane %v2419_v3, 1  ;;  %v2441_v19 = vld [vmem:[%s2252_s5 + $0xf0] sm:$0xff]  ;;  %v2444_v20 = vld [vmem:[%s2252_s5 + $0xf8] sm:$0xff]  ;;  %v2450_v29 = vld [vmem:[%s2252_s5 + $0xe8] sm:$0x3] }
  0x29   : > { %510 = vrot.lane.b32.xlu1 %v2306_v22, %s2164_s6  ;;  %506 = vrot.lane.b32.xlu0 %v321_v23, %s2164_s6  ;;  %4313 = vst [vmem:[#allocation16_spill] sm:$0xff] %v2372_v47  ;;  %v2432_v11 = vsel %vm316_vm0, %v358_v4, %v360_v6  ;;  %v2435_v17 = vsel %vm316_vm0, %v357_v9, %v358_v4  ;;  %v2447_v23 = vld [vmem:[%s2252_s5 + $0xe0] sm:$0xff]  ;;  %v2453_v30 = vld [vmem:[%s2252_s5 + $0xd8] sm:$0xff]  ;;  %v367_v31 = vrot.slane %v2441_v19, 1  ;;  %v368_v32 = vrot.slane %v2444_v20, 1  ;;  %s2060_s14 = scalar_lea.hbm %s4212_s2, 32 }
  0x2a   : > { %4314 = vst [vmem:[#allocation17_spill] sm:$0xff] %v2401_v58  ;;  %v2438_v18 = vsel %vm316_vm0, %v353_v54, %v355_v10  ;;  %v363_v33 = vrot.slane %v2447_v23, 1  ;;  %v365_v41 = vrot.slane %v2450_v29, 1  ;;  %v362_v42 = vrot.slane %v2453_v30, 1  ;;  %v2476_v54 = vld [vmem:[%s2252_s5 + $0x110] sm:$0xff]  ;;  %v2482_v56 = vld [vmem:[%s2252_s5 + $0x108] sm:$0xff] }
  0x2b   : > { %4315 = vst [vmem:[#allocation18_spill] sm:$0xff] %v2404_v59  ;;  %v2467_v43 = vsel %vm316_vm0, %v367_v31, %v368_v32  ;;  %v2479_v55 = vld [vmem:[%s2252_s5 + $0x118] sm:$0x3]  ;;  %v2485_v57 = vld [vmem:[%s2252_s5 + $0x100] sm:$0x3]  ;;  %v373_v4 = vrot.slane %v2476_v54, 1 }
  0x2c   : > { %4316 = vst [vmem:[#allocation19_spill] sm:$0xff] %v2407_v60  ;;  %v2470_v44 = vsel %vm316_vm0, %v363_v33, %v365_v41  ;;  %v2473_v53 = vsel %vm316_vm0, %v362_v42, %v363_v33  ;;  %v375_v6 = vrot.slane %v2479_v55, 1  ;;  %v372_v9 = vrot.slane %v2482_v56, 1  ;;  %v2507_v42 = vld [vmem:[%s2252_s5 + $0x138] sm:$0xff] }
  0x2d   : > { %4317 = vst [vmem:[#allocation20_spill] sm:$0xff] %v2432_v11  ;;  %v370_v10 = vrot.slane %v2485_v57, 1 }
  0x2e   : > { %4318 = vst [vmem:[#allocation21_spill] sm:$0xff] %v2435_v17  ;;  %v2498_v31 = vsel %vm316_vm0, %v373_v4, %v375_v6  ;;  %v2501_v33 = vsel %vm316_vm0, %v372_v9, %v373_v4  ;;  %v2519_v6 = vld [vmem:[%s2252_s5 + $0x120] sm:$0xff] }
  0x2f   : > { %4319 = vst [vmem:[#allocation22_spill] sm:$0xff] %v2438_v18  ;;  %v2504_v41 = vsel %vm316_vm0, %v368_v32, %v370_v10  ;;  %v382_v32 = vrot.slane %v2507_v42, 1 }
  0x30   : > { %520 = vrot.lane.b32.xlu2 %v2335_v34, %s2164_s6  ;;  %4320 = vst [vmem:[#allocation23_spill] sm:$0xff] %v2467_v43  ;;  %v2579_v34 = vld [vmem:[%s2252_s5 + $0x168] sm:$0xff] }
  0x31   : > { %518 = vrot.lane.b32.xlu1 %v2338_v35, %s2164_s6  ;;  %516 = vrot.lane.b32.xlu0 %v2341_v36, %s2164_s6  ;;  %4321 = vst [vmem:[#allocation24_spill] sm:$0xff] %v2470_v44 }
  0x32   : > { %4322 = vst [vmem:[#allocation25_spill] sm:$0xff] %v2473_v53 }
  0x33   : > { %4323 = vst [vmem:[#allocation26_spill] sm:$0xff] %v2498_v31 }
  0x34   : > { %4324 = vst [vmem:[#allocation27_spill] sm:$0xff] %v2501_v33 }
  0x35   : > { %4325 = vst [vmem:[#allocation28_spill] sm:$0xff] %v2504_v41 }
  0x38   : > { %526 = vrot.lane.b32.xlu2 %v2366_v45, %s2164_s6  ;;  %v2551_v45 = vld [vmem:[%s2252_s5 + $0x148] sm:$0x3] }
  0x39   : > { %524 = vrot.lane.b32.xlu1 %v2369_v46, %s2164_s6  ;;  %522 = vrot.lane.b32.xlu0 %v2372_v47, %s2164_s6 }
  0x40   : > { %532 = vrot.lane.b32.xlu2 %v2401_v58, %s2164_s6 }
  0x41   : > { %530 = vrot.lane.b32.xlu1 %v2404_v59, %s2164_s6  ;;  %528 = vrot.lane.b32.xlu0 %v2407_v60, %s2164_s6 }
  0x48   : > { %538 = vrot.lane.b32.xlu2 %v2432_v11, %s2164_s6  ;;  %v2513_v11 = vld [vmem:[%s2252_s5 + $0x128] sm:$0xff] }
  0x49   : > { %536 = vrot.lane.b32.xlu1 %v2435_v17, %s2164_s6  ;;  %534 = vrot.lane.b32.xlu0 %v2438_v18, %s2164_s6  ;;  %v378_v9 = vrot.slane %v2513_v11, 1  ;;  %v2545_v18 = vld [vmem:[%s2252_s5 + $0x160] sm:$0x3]  ;;  %v2548_v17 = vld [vmem:[%s2252_s5 + $0x150] sm:$0xff] }
  0x50   : > { %544 = vrot.lane.b32.xlu2 %v2467_v43, %s2164_s6  ;;  %v2510_v43 = vld [vmem:[%s2252_s5 + $0x140] sm:$0xff] }
  0x51   : > { %542 = vrot.lane.b32.xlu1 %v2470_v44, %s2164_s6  ;;  %540 = vrot.lane.b32.xlu0 %v2473_v53, %s2164_s6  ;;  %v2516_v53 = vld [vmem:[%s2252_s5 + $0x130] sm:$0x3]  ;;  %v383_v4 = vrot.slane %v2510_v43, 1  ;;  %v377_v44 = vrot.slane %v2519_v6, 1 }
  0x52   : > { %v380_v10 = vrot.slane %v2516_v53, 1 }
  0x53   : > { %v2533_v58 = vsel %vm316_vm0, %v382_v32, %v383_v4  ;;  %v390_v32 = vrot.slane %v2545_v18, 1 }
  0x54   : > { %4326 = vst [vmem:[#allocation29_spill] sm:$0xff] %v2533_v58 }
  0x58   : > { %550 = vrot.lane.b32.xlu2 %v2498_v31, %s2164_s6  ;;  %v2536_v31 = vsel %vm316_vm0, %v378_v9, %v380_v10  ;;  %v385_v10 = vrot.slane %v2551_v45, 1 }
  0x59   : > { %548 = vrot.lane.b32.xlu1 %v2501_v33, %s2164_s6  ;;  %546 = vrot.lane.b32.xlu0 %v2504_v41, %s2164_s6  ;;  %4327 = vst [vmem:[#allocation30_spill] sm:$0xff] %v2536_v31  ;;  %v2539_v33 = vsel %vm316_vm0, %v377_v44, %v378_v9  ;;  %v2542_v41 = vld [vmem:[%s2252_s5 + $0x158] sm:$0xff]  ;;  %v387_v9 = vrot.slane %v2548_v17, 1 }
  0x5a   : > { %4328 = vst [vmem:[#allocation31_spill] sm:$0xff] %v2539_v33  ;;  %v388_v44 = vrot.slane %v2542_v41, 1 }
  0x5c   : > { %v2564_v60 = vsel %vm316_vm0, %v388_v44, %v390_v32  ;;  %v2567_v59 = vsel %vm316_vm0, %v387_v9, %v388_v44  ;;  %v398_v44 = vrot.slane %v2270_v7, 2  ;;  %v404_v7 = vrot.slane %v2266_v5, 2 }
  0x5d   : > { %4329 = vst [vmem:[#allocation32_spill] sm:$0xff] %v2564_v60 }
  0x5e   : > { %4330 = vst [vmem:[#allocation33_spill] sm:$0xff] %v2567_v59 }
  0x60   : > { %556 = vrot.lane.b32.xlu2 %v2533_v58, %s2164_s6  ;;  %v2570_v58 = vsel %vm316_vm0, %v383_v4, %v385_v10  ;;  %v399_v4 = vrot.slane %v2273_v8, 2  ;;  %v392_v10 = vrot.slane %v2579_v34, 1  ;;  %v406_v8 = vrot.slane %v2285_v14, 2 }
  0x61   : > { %554 = vrot.lane.b32.xlu1 %v2536_v31, %s2164_s6  ;;  %552 = vrot.lane.b32.xlu0 %v2539_v33, %s2164_s6  ;;  %4331 = vst [vmem:[#allocation34_spill] sm:$0xff] %v2570_v58  ;;  %v2573_v31 = vld [vmem:[%s2252_s5 + $0x170] sm:$0xff]  ;;  %v2576_v33 = vld [vmem:[%s2252_s5 + $0x178] sm:$0x3]  ;;  %v413_v14 = vrot.slane %v2322_v28, 2 }
  0x62   : > { %v393_v32 = vrot.slane %v2573_v31, 1  ;;  %v395_v9 = vrot.slane %v2576_v33, 1  ;;  %v400_v47 = vsel %vm397_vm1, %v398_v44, %v399_v4  ;;  %v403_v44 = vrot.slane %v2261_v2, 2 }
  0x68   : > { %562 = vrot.lane.b32.xlu2 %v2564_v60, %s2164_s6  ;;  %v2594_v60 = vsel %vm316_vm0, %v393_v32, %v395_v9  ;;  %v401_v9 = vrot.slane %v2288_v15, 2  ;;  %v414_v15 = vrot.slane %v2316_v26, 2 }
  0x69   : > { %560 = vrot.lane.b32.xlu1 %v2567_v59, %s2164_s6  ;;  %558 = vrot.lane.b32.xlu0 %v2570_v58, %s2164_s6  ;;  %4332 = vst [vmem:[#allocation35_spill] sm:$0xff] %v2594_v60  ;;  %v2597_v59 = vsel %vm316_vm0, %v392_v10, %v393_v32  ;;  %v2609_v32 = vsel %vm397_vm1, %v404_v7, %v406_v8  ;;  %v409_v8 = vrot.slane %v2258_v1, 2 }
  0x6a   : > { %4333 = vst [vmem:[#allocation36_spill] sm:$0xff] %v2597_v59  ;;  %v2612_v10 = vsel %vm397_vm1, %v403_v44, %v404_v7  ;;  %v411_v7 = vrot.slane %v2279_v12, 2  ;;  %v2628_v44 = vsel %vm397_vm1, %v413_v14, %v414_v15  ;;  %v419_v12 = vrot.slane %v2313_v25, 2 }
  0x6b   : > { %4334 = vst [vmem:[#allocation37_spill] sm:$0xff] %v2609_v32  ;;  %v421_v14 = vrot.slane %v2353_v40, 2  ;;  %v429_v40 = vrot.slane %v2381_v50, 2 }
  0x6c   : > { %4336 = vst [vmem:[#allocation39_spill] sm:$0xff] %v2628_v44 }
  0x70   : > { %600 = vrot.lane.b32.xlu2 %v400_v47, %s2165_s7  ;;  %v402_v47 = vsel %vm397_vm1, %v399_v4, %v401_v9  ;;  %v408_v4 = vrot.slane %v2255_v0, 2  ;;  %v2631_v9 = vsel %vm397_vm1, %v409_v8, %v411_v7  ;;  %v418_v7 = vrot.slane %v2310_v24, 2 }
  0x71   : > { %566 = vrot.lane.b32.xlu1 %v2594_v60, %s2164_s6  ;;  %564 = vrot.lane.b32.xlu0 %v2597_v59, %s2164_s6  ;;  %4337 = vst [vmem:[#allocation40_spill] sm:$0xff] %v2631_v9  ;;  %s1744_s6 = scalar_lea.hbm %s4212_s2, %s1950_s29 }
  0x78   : > { %606 = vrot.lane.b32.xlu2 %v2609_v32, %s2165_s7 }
  0x79   : > { %604 = vrot.lane.b32.xlu1 %v2612_v10, %s2165_s7  ;;  %602 = vrot.lane.b32.xlu0 %v402_v47, %s2165_s7  ;;  %v2634_v47 = vsel %vm397_vm1, %v408_v4, %v409_v8  ;;  %v416_v8 = vrot.slane %v2319_v27, 2  ;;  %v2649_v4 = vsel %vm397_vm1, %v419_v12, %v421_v14  ;;  %v428_v27 = vrot.slane %v2387_v52, 2 }
  0x7a   : > { %v2622_v59 = vpop.permute.xlu2 %512  ;;  %4338 = vst [vmem:[#allocation41_spill] sm:$0xff] %v2634_v47 }
  0x7b   : > { %4335 = vst [vmem:[#allocation38_spill] sm:$0xff] %v2622_v59  ;;  %v2655_v32 = vsel %vm397_vm1, %v414_v15, %v416_v8  ;;  %v426_v15 = vrot.slane %v2347_v38, 2  ;;  %v2671_v8 = vsel %vm397_vm1, %v428_v27, %v429_v40  ;;  %v434_v38 = vrot.slane %v2378_v49, 2 }
  0x7c   : > { %4340 = vst [vmem:[#allocation43_spill] sm:$0xff] %v2649_v4  ;;  %v436_v27 = vrot.slane %v2419_v3, 2  ;;  %v444_v3 = vrot.slane %v2447_v23, 2 }
  0x7d   : > { %4342 = vst [vmem:[#allocation45_spill] sm:$0xff] %v2655_v32 }
  0x7e   : > { %4344 = vst [vmem:[#allocation47_spill] sm:$0xff] %v2671_v8 }
  0x80   : > { %612 = vrot.lane.b32.xlu2 %v2628_v44, %s2165_s7  ;;  %v2652_v44 = vsel %vm397_vm1, %v418_v7, %v419_v12  ;;  %v424_v12 = vrot.slane %v2344_v37, 2  ;;  %v423_v7 = vrot.slane %v2350_v39, 2 }
  0x81   : > { %610 = vrot.lane.b32.xlu1 %v2631_v9, %s2165_s7  ;;  %608 = vrot.lane.b32.xlu0 %v2634_v47, %s2165_s7  ;;  %4341 = vst [vmem:[#allocation44_spill] sm:$0xff] %v2652_v44 }
  0x82   : > { %v2644_v59 = vpop.permute.xlu2 %514 }
  0x83   : > { %4339 = vst [vmem:[#allocation42_spill] sm:$0xff] %v2644_v59  ;;  %v2674_v59 = vsel %vm397_vm1, %v424_v12, %v426_v15  ;;  %v433_v15 = vrot.slane %v2375_v48, 2 }
  0x84   : > { %4345 = vst [vmem:[#allocation48_spill] sm:$0xff] %v2674_v59 }
  0x88   : > { %618 = vrot.lane.b32.xlu2 %v2649_v4, %s2165_s7  ;;  %v2677_v4 = vsel %vm397_vm1, %v423_v7, %v424_v12  ;;  %v431_v12 = vrot.slane %v2384_v51, 2  ;;  %v443_v51 = vrot.slane %v2453_v30, 2 }
  0x89   : > { %616 = vrot.lane.b32.xlu1 %v2652_v44, %s2165_s7  ;;  %614 = vrot.lane.b32.xlu0 %v2655_v32, %s2165_s7  ;;  %4346 = vst [vmem:[#allocation49_spill] sm:$0xff] %v2677_v4 }
  0x8a   : > { %v2665_v14 = vpop.permute.xlu2 %520 }
  0x8b   : > { %4343 = vst [vmem:[#allocation46_spill] sm:$0xff] %v2665_v14 }
  0x90   : > { %624 = vrot.lane.b32.xlu2 %v2671_v8, %s2165_s7  ;;  %v2696_v8 = vsel %vm397_vm1, %v434_v38, %v436_v27 }
  0x91   : > { %622 = vrot.lane.b32.xlu1 %v2674_v59, %s2165_s7  ;;  %620 = vrot.lane.b32.xlu0 %v2677_v4, %s2165_s7  ;;  %4350 = vst [vmem:[#allocation53_spill] sm:$0xff] %v2696_v8  ;;  %v2699_v59 = vsel %vm397_vm1, %v433_v15, %v434_v38  ;;  %v2702_v4 = vsel %vm397_vm1, %v429_v40, %v431_v12  ;;  %v439_v38 = vrot.slane %v2410_v61, 2  ;;  %v441_v40 = vrot.slane %v2413_v62, 2 }
  0x92   : > { %v2687_v14 = vpop.permute.xlu2 %526  ;;  %4351 = vst [vmem:[#allocation54_spill] sm:$0xff] %v2699_v59  ;;  %v438_v15 = vrot.slane %v2416_v63, 2  ;;  %v449_v62 = vrot.slane %v2444_v20, 2 }
  0x93   : > { %4347 = vst [vmem:[#allocation50_spill] sm:$0xff] %v2687_v14  ;;  %v2691_v7 = vpop.permute.xlu1 %508  ;;  %v2693_v32 = vpop.permute.xlu0 %504 }
  0x94   : > { %4348 = vst [vmem:[#allocation51_spill] sm:$0xff] %v2691_v7  ;;  %v2722_v7 = vsel %vm397_vm1, %v443_v51, %v444_v3  ;;  %v451_v51 = vrot.slane %v2485_v57, 2  ;;  %v459_v57 = vrot.slane %v2513_v11, 2 }
  0x95   : > { %4349 = vst [vmem:[#allocation52_spill] sm:$0xff] %v2693_v32  ;;  %v2725_v32 = vsel %vm397_vm1, %v439_v38, %v441_v40  ;;  %v448_v40 = vrot.slane %v2441_v19, 2 }
  0x96   : > { %4352 = vst [vmem:[#allocation55_spill] sm:$0xff] %v2702_v4 }
  0x97   : > { %4356 = vst [vmem:[#allocation59_spill] sm:$0xff] %v2722_v7 }
  0x98   : > { %630 = vrot.lane.b32.xlu2 %v2696_v8, %s2165_s7  ;;  %v2728_v8 = vsel %vm397_vm1, %v438_v15, %v439_v38  ;;  %v446_v38 = vrot.slane %v2450_v29, 2  ;;  %v458_v29 = vrot.slane %v2519_v6, 2 }
  0x99   : > { %628 = vrot.lane.b32.xlu1 %v2699_v59, %s2165_s7  ;;  %626 = vrot.lane.b32.xlu0 %v2702_v4, %s2165_s7  ;;  %4357 = vst [vmem:[#allocation60_spill] sm:$0xff] %v2728_v8 }
  0x9a   : > { %v2712_v27 = vpop.permute.xlu2 %532 }
  0x9b   : > { %4353 = vst [vmem:[#allocation56_spill] sm:$0xff] %v2712_v27  ;;  %v2717_v12 = vpop.permute.xlu1 %510  ;;  %v2719_v14 = vpop.permute.xlu0 %506 }
  0x9c   : > { %4354 = vst [vmem:[#allocation57_spill] sm:$0xff] %v2717_v12 }
  0x9d   : > { %4355 = vst [vmem:[#allocation58_spill] sm:$0xff] %v2719_v14  ;;  %v2747_v14 = vsel %vm397_vm1, %v449_v62, %v451_v51 }
  0x9e   : > { %4361 = vst [vmem:[#allocation64_spill] sm:$0xff] %v2747_v14 }
  0xa0   : > { %636 = vrot.lane.b32.xlu2 %v2722_v7, %s2165_s7  ;;  %v2750_v7 = vsel %vm397_vm1, %v448_v40, %v449_v62  ;;  %v454_v62 = vrot.slane %v2476_v54, 2  ;;  %v453_v40 = vrot.slane %v2482_v56, 2 }
  0xa1   : > { %634 = vrot.lane.b32.xlu1 %v2725_v32, %s2165_s7  ;;  %632 = vrot.lane.b32.xlu0 %v2728_v8, %s2165_s7  ;;  %4362 = vst [vmem:[#allocation65_spill] sm:$0xff] %v2750_v7  ;;  %v2753_v8 = vsel %vm397_vm1, %v444_v3, %v446_v38  ;;  %v456_v3 = vrot.slane %v2479_v55, 2  ;;  %v464_v55 = vrot.slane %v2510_v43, 2 }
  0xa2   : > { %v2738_v27 = vpop.permute.xlu2 %538 }
  0xa3   : > { %4358 = vst [vmem:[#allocation61_spill] sm:$0xff] %v2738_v27  ;;  %v2742_v15 = vpop.permute.xlu1 %518  ;;  %v2744_v12 = vpop.permute.xlu0 %516  ;;  %v2776_v27 = vsel %vm397_vm1, %v454_v62, %v456_v3  ;;  %v463_v3 = vrot.slane %v2507_v42, 2 }
  0xa4   : > { %4359 = vst [vmem:[#allocation62_spill] sm:$0xff] %v2742_v15  ;;  %v2773_v15 = vsel %vm397_vm1, %v458_v29, %v459_v57  ;;  %v466_v29 = vrot.slane %v2551_v45, 2  ;;  %v473_v45 = vrot.slane %v2579_v34, 2 }
  0xa5   : > { %4360 = vst [vmem:[#allocation63_spill] sm:$0xff] %v2744_v12 }
  0xa6   : > { %4366 = vst [vmem:[#allocation69_spill] sm:$0xff] %v2773_v15 }
  0xa7   : > { %4367 = vst [vmem:[#allocation70_spill] sm:$0xff] %v2776_v27 }
  0xa8   : > { %642 = vrot.lane.b32.xlu2 %v2747_v14, %s2165_s7  ;;  %v2779_v14 = vsel %vm397_vm1, %v453_v40, %v454_v62  ;;  %v461_v62 = vrot.slane %v2516_v53, 2  ;;  %v474_v53 = vrot.slane %v2573_v31, 2 }
  0xa9   : > { %640 = vrot.lane.b32.xlu1 %v2750_v7, %s2165_s7  ;;  %638 = vrot.lane.b32.xlu0 %v2753_v8, %s2165_s7  ;;  %4368 = vst [vmem:[#allocation71_spill] sm:$0xff] %v2779_v14 }
  0xaa   : > { %v2763_v51 = vpop.permute.xlu2 %544 }
  0xab   : > { %4363 = vst [vmem:[#allocation66_spill] sm:$0xff] %v2763_v51  ;;  %v2768_v38 = vpop.permute.xlu1 %524  ;;  %v2770_v12 = vpop.permute.xlu0 %522  ;;  %v2798_v51 = vsel %vm397_vm1, %v464_v55, %v466_v29 }
  0xac   : > { %4364 = vst [vmem:[#allocation67_spill] sm:$0xff] %v2768_v38 }
  0xad   : > { %4365 = vst [vmem:[#allocation68_spill] sm:$0xff] %v2770_v12 }
  0xae   : > { %4372 = vst [vmem:[#allocation75_spill] sm:$0xff] %v2798_v51 }
  0xb0   : > { %648 = vrot.lane.b32.xlu2 %v2773_v15, %s2165_s7  ;;  %v2801_v15 = vsel %vm397_vm1, %v463_v3, %v464_v55  ;;  %v469_v55 = vrot.slane %v2542_v41, 2  ;;  %v468_v3 = vrot.slane %v2548_v17, 2 }
  0xb1   : > { %646 = vrot.lane.b32.xlu1 %v2776_v27, %s2165_s7  ;;  %644 = vrot.lane.b32.xlu0 %v2779_v14, %s2165_s7  ;;  %4373 = vst [vmem:[#allocation76_spill] sm:$0xff] %v2801_v15  ;;  %v2804_v14 = vsel %vm397_vm1, %v459_v57, %v461_v62  ;;  %v471_v57 = vrot.slane %v2545_v18, 2 }
  0xb2   : > { %v2789_v38 = vpop.permute.xlu2 %550  ;;  %4374 = vst [vmem:[#allocation77_spill] sm:$0xff] %v2804_v14 }
  0xb3   : > { %4369 = vst [vmem:[#allocation72_spill] sm:$0xff] %v2789_v38  ;;  %v2793_v40 = vpop.permute.xlu1 %530  ;;  %v2795_v12 = vpop.permute.xlu0 %528  ;;  %v2827_v38 = vsel %vm397_vm1, %v469_v55, %v471_v57 }
  0xb4   : > { %4370 = vst [vmem:[#allocation73_spill] sm:$0xff] %v2793_v40  ;;  %v2824_v40 = vsel %vm397_vm1, %v473_v45, %v474_v53  ;;  %v476_v45 = vrot.slane %v2576_v33, 2 }
  0xb5   : > { %4371 = vst [vmem:[#allocation74_spill] sm:$0xff] %v2795_v12 }
  0xb6   : > { %4377 = vst [vmem:[#allocation80_spill] sm:$0xff] %v2824_v40 }
  0xb7   : > { %4378 = vst [vmem:[#allocation81_spill] sm:$0xff] %v2827_v38 }
  0xb8   : > { %654 = vrot.lane.b32.xlu2 %v2798_v51, %s2165_s7  ;;  %v2830_v51 = vsel %vm397_vm1, %v468_v3, %v469_v55  ;;  %v2846_v55 = vsel %vm397_vm1, %v474_v53, %v476_v45 }
  0xb9   : > { %652 = vrot.lane.b32.xlu1 %v2801_v15, %s2165_s7  ;;  %650 = vrot.lane.b32.xlu0 %v2804_v14, %s2165_s7  ;;  %4379 = vst [vmem:[#allocation82_spill] sm:$0xff] %v2830_v51 }
  0xba   : > { %v2814_v29 = vpop.permute.xlu2 %556  ;;  %4382 = vst [vmem:[#allocation85_spill] sm:$0xff] %v2846_v55 }
  0xbb   : > { %4375 = vst [vmem:[#allocation78_spill] sm:$0xff] %v2814_v29  ;;  %v2819_v62 = vpop.permute.xlu1 %536  ;;  %v2821_v12 = vpop.permute.xlu0 %534 }
  0xbc   : > { %4376 = vst [vmem:[#allocation79_spill] sm:$0xff] %v2819_v62 }
  0xc0   : > { %660 = vrot.lane.b32.xlu2 %v2824_v40, %s2165_s7 }
  0xc1   : > { %658 = vrot.lane.b32.xlu1 %v2827_v38, %s2165_s7  ;;  %656 = vrot.lane.b32.xlu0 %v2830_v51, %s2165_s7 }
  0xc2   : > { %v2838_v18 = vpop.permute.xlu2 %562 }
  0xc3   : > { %4380 = vst [vmem:[#allocation83_spill] sm:$0xff] %v2838_v18  ;;  %v2841_v29 = vpop.permute.xlu1 %542  ;;  %v2843_v57 = vpop.permute.xlu0 %540 }
  0xc4   : > { %4381 = vst [vmem:[#allocation84_spill] sm:$0xff] %v2841_v29 }
  0xc8   : > { %698 = vrot.lane.b32.xlu2 %v2266_v5, %s2166_s8 }
  0xc9   : > { %696 = vrot.lane.b32.xlu1 %v2261_v2, %s2166_s8  ;;  %662 = vrot.lane.b32.xlu0 %v2846_v55, %s2165_s7  ;;  %s1746_s7 = sshll.u32 %s194_s28, 4  ;;  %s1747_s7 = int_to_ptr.vmem [resolvable:$true] %s1746_s7 }
  0xca   : > { %v2854_v3 = vpop.permute.xlu2 %600 }
  0xcb   : > { %4383 = vst [vmem:[#allocation86_spill] sm:$0xff] %v2854_v3  ;;  %v2856_v33 = vpop.permute.xlu1 %548  ;;  %v2858_v18 = vpop.permute.xlu0 %546 }
  0xcc   : > { %4384 = vst [vmem:[#allocation87_spill] sm:$0xff] %v2856_v33 }
  0xd0   : > { %704 = vrot.lane.b32.xlu2 %v2322_v28, %s2166_s8 }
  0xd1   : > { %702 = vrot.lane.b32.xlu1 %v2258_v1, %s2166_s8  ;;  %700 = vrot.lane.b32.xlu0 %v2255_v0, %s2166_s8 }
  0xd2   : > { %v2866_v5 = vpop.permute.xlu2 %606 }
  0xd3   : > { %4385 = vst [vmem:[#allocation88_spill] sm:$0xff] %v2866_v5  ;;  %v2868_v2 = vpop.permute.xlu1 %554  ;;  %v2870_v53 = vpop.permute.xlu0 %552 }
  0xd4   : > { %4386 = vst [vmem:[#allocation89_spill] sm:$0xff] %v2868_v2 }
  0xd8   : > { %710 = vrot.lane.b32.xlu2 %v2313_v25, %s2166_s8 }
  0xd9   : > { %708 = vrot.lane.b32.xlu1 %v2310_v24, %s2166_s8  ;;  %706 = vrot.lane.b32.xlu0 %v2316_v26, %s2166_s8 }
  0xda   : > { %v2878_v45 = vpop.permute.xlu2 %612 }
  0xdb   : > { %4387 = vst [vmem:[#allocation90_spill] sm:$0xff] %v2878_v45  ;;  %v2880_v3 = vpop.permute.xlu1 %560  ;;  %v2882_v33 = vpop.permute.xlu0 %558 }
  0xdc   : > { %4388 = vst [vmem:[#allocation91_spill] sm:$0xff] %v2880_v3 }
  0xe0   : > { %716 = vrot.lane.b32.xlu2 %v2387_v52, %s2166_s8 }
  0xe1   : > { %714 = vrot.lane.b32.xlu1 %v2344_v37, %s2166_s8  ;;  %712 = vrot.lane.b32.xlu0 %v2350_v39, %s2166_s8 }
  0xe2   : > { %v2890_v5 = vpop.permute.xlu2 %618 }
  0xe3   : > { %4389 = vst [vmem:[#allocation92_spill] sm:$0xff] %v2890_v5  ;;  %v2892_v2 = vpop.permute.xlu1 %566  ;;  %v2894_v29 = vpop.permute.xlu0 %564 }
  0xe4   : > { %4390 = vst [vmem:[#allocation93_spill] sm:$0xff] %v2892_v2 }
  0xe5   : > { %4391 = vst [vmem:[#allocation94_spill] sm:$0xff] %v2894_v29 }
  0xe8   : > { %722 = vrot.lane.b32.xlu2 %v2378_v49, %s2166_s8 }
  0xe9   : > { %720 = vrot.lane.b32.xlu1 %v2375_v48, %s2166_s8  ;;  %718 = vrot.lane.b32.xlu0 %v2381_v50, %s2166_s8 }
  0xea   : > { %v2902_v45 = vpop.permute.xlu2 %624 }
  0xeb   : > { %4392 = vst [vmem:[#allocation95_spill] sm:$0xff] %v2902_v45  ;;  %v2904_v3 = vpop.permute.xlu1 %604  ;;  %v2906_v62 = vpop.permute.xlu0 %602 }
  0xec   : > { %4393 = vst [vmem:[#allocation96_spill] sm:$0xff] %v2904_v3 }
  0xed   : > { %4394 = vst [vmem:[#allocation97_spill] sm:$0xff] %v2906_v62 }
  0xf0   : > { %728 = vrot.lane.b32.xlu2 %v2453_v30, %s2166_s8 }
  0xf1   : > { %726 = vrot.lane.b32.xlu1 %v2410_v61, %s2166_s8  ;;  %724 = vrot.lane.b32.xlu0 %v2416_v63, %s2166_s8 }
  0xf2   : > { %v2914_v29 = vpop.permute.xlu2 %630 }
  0xf3   : > { %v2916_v48 = vpop.permute.xlu1 %610  ;;  %v2918_v2 = vpop.permute.xlu0 %608 }
  0xf4   : > { %4395 = vst [vmem:[#allocation98_spill] sm:$0xff] %v2916_v48 }
  0xf5   : > { %4396 = vst [vmem:[#allocation99_spill] sm:$0xff] %v2918_v2 }
  0xf8   : > { %734 = vrot.lane.b32.xlu2 %v2444_v20, %s2166_s8 }
  0xf9   : > { %732 = vrot.lane.b32.xlu1 %v2441_v19, %s2166_s8  ;;  %730 = vrot.lane.b32.xlu0 %v2447_v23, %s2166_s8 }
  0xfa   : > { %v2926_v45 = vpop.permute.xlu2 %636 }
  0xfb   : > { %v2928_v5 = vpop.permute.xlu1 %616  ;;  %v2930_v63 = vpop.permute.xlu0 %614 }
  0xfc   : > { %4397 = vst [vmem:[#allocation100_spill] sm:$0xff] %v2928_v5 }
  0xfd   : > { %4398 = vst [vmem:[#allocation101_spill] sm:$0xff] %v2930_v63 }
 0x100   : > { %740 = vrot.lane.b32.xlu2 %v2519_v6, %s2166_s8 }
 0x101   : > { %738 = vrot.lane.b32.xlu1 %v2476_v54, %s2166_s8  ;;  %736 = vrot.lane.b32.xlu0 %v2482_v56, %s2166_s8 }
 0x102   : > { %v2938_v19 = vpop.permute.xlu2 %642 }
 0x103   : > { %v2940_v48 = vpop.permute.xlu1 %622  ;;  %v2942_v3 = vpop.permute.xlu0 %620 }
 0x104   : > { %4399 = vst [vmem:[#allocation102_spill] sm:$0xff] %v2940_v48  ;;  %v2969_v48 = vld [vmem:[%s2252_s5 + $0x188] sm:$0xff] }
 0x105   : > { %4400 = vst [vmem:[#allocation103_spill] sm:$0xff] %v2942_v3 }
 0x108   : > { %746 = vrot.lane.b32.xlu2 %v2510_v43, %s2166_s8 }
 0x109   : > { %744 = vrot.lane.b32.xlu1 %v2507_v42, %s2166_s8  ;;  %742 = vrot.lane.b32.xlu0 %v2513_v11, %s2166_s8 }
 0x10a   : > { %v2950_v54 = vpop.permute.xlu2 %648 }
 0x10b   : > { %v2952_v56 = vpop.permute.xlu1 %628  ;;  %v2954_v5 = vpop.permute.xlu0 %626 }
 0x10c   : > { %4401 = vst [vmem:[#allocation104_spill] sm:$0xff] %v2952_v56  ;;  %v2972_v56 = vld [vmem:[%s2252_s5 + $0x180] sm:$0xff] }
 0x10d   : > { %4402 = vst [vmem:[#allocation105_spill] sm:$0xff] %v2954_v5 }
 0x110   : > { %752 = vrot.lane.b32.xlu2 %v2579_v34, %s2166_s8 }
 0x111   : > { %750 = vrot.lane.b32.xlu1 %v2542_v41, %s2166_s8  ;;  %748 = vrot.lane.b32.xlu0 %v2548_v17, %s2166_s8 }
 0x112   : > { %v2962_v3 = vpop.permute.xlu2 %654 }
 0x113   : > { %v2964_v42 = vpop.permute.xlu1 %634  ;;  %v2966_v11 = vpop.permute.xlu0 %632 }
 0x118   : > { %758 = vrot.lane.b32.xlu2 %v2969_v48, %s2166_s8 }
 0x119   : > { %756 = vrot.lane.b32.xlu1 %v2972_v56, %s2166_s8  ;;  %754 = vrot.lane.b32.xlu0 %v2573_v31, %s2166_s8  ;;  %s1748_s8 = sshll.u32 %s1744_s6, 4  ;;  %s1749_s8 = int_to_ptr.hbm [resolvable:$true] %s1748_s8 }
 0x11a   : > { %v2980_v34 = vpop.permute.xlu2 %660 }
 0x11b   : > { %4403 = vst [vmem:[#allocation106_spill] sm:$0xff] %v2980_v34  ;;  %v2982_v17 = vpop.permute.xlu1 %640  ;;  %v2984_v41 = vpop.permute.xlu0 %638  ;;  %v4412_v34 = vld [vmem:[#allocation16_spill] sm:$0xff] }
 0x11c   : > { %4404 = vst [vmem:[#allocation107_spill] sm:$0xff] %v2982_v17 }
 0x11d   : > { %4405 = vst [vmem:[#allocation108_spill] sm:$0xff] %v2984_v41 }
 0x120   : > { %796 = vrot.lane.b32.xlu2 %v2282_v13, %s2167_s9 }
 0x121   : > { %794 = vrot.lane.b32.xlu1 %v2306_v22, %s2167_s9  ;;  %792 = vrot.lane.b32.xlu0 %v2293_v16, %s2167_s9 }
 0x122   : > { %v2992_v5 = vpop.permute.xlu2 %698 }
 0x123   : > { %4406 = vst [vmem:[#allocation109_spill] sm:$0xff] %v2992_v5  ;;  %v2994_v63 = vpop.permute.xlu1 %646  ;;  %v2996_v31 = vpop.permute.xlu0 %644 }
 0x124   : > { %4407 = vst [vmem:[#allocation110_spill] sm:$0xff] %v2994_v63 }
 0x125   : > { %4408 = vst [vmem:[#allocation111_spill] sm:$0xff] %v2996_v31 }
 0x128   : > { %802 = vrot.lane.b32.xlu2 %v2338_v35, %s2167_s9  ;;  %v4413_v35 = vld [vmem:[#allocation11_spill] sm:$0xff] }
 0x129   : > { %800 = vrot.lane.b32.xlu1 %v2341_v36, %s2167_s9  ;;  %798 = vrot.lane.b32.xlu0 %v2303_v21, %s2167_s9 }
 0x12a   : > { %v3004_v13 = vpop.permute.xlu2 %704 }
 0x12b   : > { %4409 = vst [vmem:[#allocation112_spill] sm:$0xff] %v3004_v13  ;;  %v3006_v22 = vpop.permute.xlu1 %652  ;;  %v3008_v16 = vpop.permute.xlu0 %650  ;;  %v4417_v13 = vld [vmem:[#allocation18_spill] sm:$0xff] }
 0x12c   : > { %4410 = vst [vmem:[#allocation113_spill] sm:$0xff] %v3006_v22 }
 0x12d   : > { %4411 = vst [vmem:[#allocation114_spill] sm:$0xff] %v3008_v16  ;;  %v4418_v16 = vld [vmem:[#allocation19_spill] sm:$0xff] }
 0x130   : > { %808 = vrot.lane.b32.xlu2 %v2369_v46, %s2167_s9  ;;  %v4419_v46 = vld [vmem:[#allocation14_spill] sm:$0xff] }
 0x131   : > { %806 = vrot.lane.b32.xlu1 %v4412_v34, %s2167_s9  ;;  %804 = vrot.lane.b32.xlu0 %v4413_v35, %s2167_s9 }
 0x132   : > { %v3016_v2 = vpop.permute.xlu2 %710 }
 0x133   : > { %4414 = vst [vmem:[#allocation115_spill] sm:$0xff] %v3016_v2  ;;  %v3018_v36 = vpop.permute.xlu1 %658  ;;  %v3020_v21 = vpop.permute.xlu0 %656  ;;  %v4423_v2 = vld [vmem:[#allocation21_spill] sm:$0xff] }
 0x134   : > { %4415 = vst [vmem:[#allocation116_spill] sm:$0xff] %v3018_v36 }
 0x135   : > { %4416 = vst [vmem:[#allocation117_spill] sm:$0xff] %v3020_v21  ;;  %v4424_v21 = vld [vmem:[#allocation22_spill] sm:$0xff] }
 0x138   : > { %814 = vrot.lane.b32.xlu2 %v4417_v13, %s2167_s9  ;;  %v4425_v13 = vld [vmem:[#allocation17_spill] sm:$0xff] }
 0x139   : > { %812 = vrot.lane.b32.xlu1 %v4418_v16, %s2167_s9  ;;  %810 = vrot.lane.b32.xlu0 %v4419_v46, %s2167_s9 }
 0x13a   : > { %v3028_v22 = vpop.permute.xlu2 %716 }
 0x13b   : > { %4420 = vst [vmem:[#allocation118_spill] sm:$0xff] %v3028_v22  ;;  %v3030_v34 = vpop.permute.xlu1 %696  ;;  %v3032_v35 = vpop.permute.xlu0 %662  ;;  %v4429_v22 = vld [vmem:[#allocation24_spill] sm:$0xff] }
 0x13c   : > { %4421 = vst [vmem:[#allocation119_spill] sm:$0xff] %v3030_v34  ;;  %v4431_v34 = vld [vmem:[#allocation20_spill] sm:$0xff] }
 0x13d   : > { %4422 = vst [vmem:[#allocation120_spill] sm:$0xff] %v3032_v35  ;;  %v4430_v35 = vld [vmem:[#allocation25_spill] sm:$0xff] }
 0x140   : > { %820 = vrot.lane.b32.xlu2 %v4423_v2, %s2167_s9 }
 0x141   : > { %818 = vrot.lane.b32.xlu1 %v4424_v21, %s2167_s9  ;;  %816 = vrot.lane.b32.xlu0 %v4425_v13, %s2167_s9 }
 0x142   : > { %v3040_v36 = vpop.permute.xlu2 %722 }
 0x143   : > { %4426 = vst [vmem:[#allocation121_spill] sm:$0xff] %v3040_v36  ;;  %v3042_v16 = vpop.permute.xlu1 %702  ;;  %v3044_v46 = vpop.permute.xlu0 %700  ;;  %v4434_v36 = vld [vmem:[#allocation27_spill] sm:$0xff] }
 0x144   : > { %4427 = vst [vmem:[#allocation122_spill] sm:$0xff] %v3042_v16  ;;  %v4436_v16 = vld [vmem:[#allocation23_spill] sm:$0xff] }
 0x145   : > { %4428 = vst [vmem:[#allocation123_spill] sm:$0xff] %v3044_v46  ;;  %v4435_v46 = vld [vmem:[#allocation28_spill] sm:$0xff] }
 0x148   : > { %826 = vrot.lane.b32.xlu2 %v4429_v22, %s2167_s9 }
 0x149   : > { %824 = vrot.lane.b32.xlu1 %v4430_v35, %s2167_s9  ;;  %822 = vrot.lane.b32.xlu0 %v4431_v34, %s2167_s9 }
 0x14a   : > { %v3052_v31 = vpop.permute.xlu2 %728 }
 0x14b   : > { %v3054_v21 = vpop.permute.xlu1 %708  ;;  %v3056_v13 = vpop.permute.xlu0 %706 }
 0x14c   : > { %4432 = vst [vmem:[#allocation24_spill] sm:$0xff] %v3054_v21  ;;  %v4440_v21 = vld [vmem:[#allocation30_spill] sm:$0xff] }
 0x14d   : > { %4433 = vst [vmem:[#allocation25_spill] sm:$0xff] %v3056_v13  ;;  %v4441_v13 = vld [vmem:[#allocation31_spill] sm:$0xff] }
 0x150   : > { %832 = vrot.lane.b32.xlu2 %v4434_v36, %s2167_s9  ;;  %v4442_v36 = vld [vmem:[#allocation26_spill] sm:$0xff] }
 0x151   : > { %830 = vrot.lane.b32.xlu1 %v4435_v46, %s2167_s9  ;;  %828 = vrot.lane.b32.xlu0 %v4436_v16, %s2167_s9 }
 0x152   : > { %v3064_v63 = vpop.permute.xlu2 %734 }
 0x153   : > { %4437 = vst [vmem:[#allocation20_spill] sm:$0xff] %v3064_v63  ;;  %v3066_v5 = vpop.permute.xlu1 %714  ;;  %v3068_v62 = vpop.permute.xlu0 %712  ;;  %v4446_v63 = vld [vmem:[#allocation33_spill] sm:$0xff] }
 0x154   : > { %4438 = vst [vmem:[#allocation124_spill] sm:$0xff] %v3066_v5  ;;  %v3095_v5 = vld [vmem:[%s2252_s5 + $0x190] sm:$0x3] }
 0x155   : > { %4439 = vst [vmem:[#allocation125_spill] sm:$0xff] %v3068_v62 }
 0x158   : > { %838 = vrot.lane.b32.xlu2 %v4440_v21, %s2167_s9  ;;  %v4447_v21 = vld [vmem:[#allocation29_spill] sm:$0xff] }
 0x159   : > { %836 = vrot.lane.b32.xlu1 %v4441_v13, %s2167_s9  ;;  %834 = vrot.lane.b32.xlu0 %v4442_v36, %s2167_s9 }
 0x15a   : > { %v3076_v46 = vpop.permute.xlu2 %740 }
 0x15b   : > { %4443 = vst [vmem:[#allocation126_spill] sm:$0xff] %v3076_v46  ;;  %v3078_v2 = vpop.permute.xlu1 %720  ;;  %v3080_v16 = vpop.permute.xlu0 %718 }
 0x15c   : > { %4444 = vst [vmem:[#allocation127_spill] sm:$0xff] %v3078_v2  ;;  %v4451_v2 = vld [vmem:[#allocation32_spill] sm:$0xff] }
 0x15d   : > { %4445 = vst [vmem:[#allocation128_spill] sm:$0xff] %v3080_v16  ;;  %v4450_v16 = vld [vmem:[#allocation36_spill] sm:$0xff] }
 0x160   : > { %844 = vrot.lane.b32.xlu2 %v4446_v63, %s2167_s9  ;;  %v484_v63 = vrot.slane %v3095_v5, 1 }
 0x161   : > { %842 = vrot.lane.b32.xlu1 %v2570_v58, %s2167_s9  ;;  %840 = vrot.lane.b32.xlu0 %v4447_v21, %s2167_s9  ;;  %v482_v21 = vrot.slane %v2969_v48, 1 }
 0x162   : > { %v3088_v62 = vpop.permute.xlu2 %746 }
 0x163   : > { %4448 = vst [vmem:[#allocation129_spill] sm:$0xff] %v3088_v62  ;;  %v3090_v13 = vpop.permute.xlu1 %726  ;;  %v3092_v36 = vpop.permute.xlu0 %724  ;;  %v481_v62 = vrot.slane %v2972_v56, 1 }
 0x164   : > { %4449 = vst [vmem:[#allocation130_spill] sm:$0xff] %v3092_v36 }
 0x168   : > { %850 = vrot.lane.b32.xlu2 %v2594_v60, %s2167_s9  ;;  %v3113_v60 = vsel %vm316_vm0, %v482_v21, %v484_v63 }
 0x169   : > { %848 = vrot.lane.b32.xlu1 %v4450_v16, %s2167_s9  ;;  %846 = vrot.lane.b32.xlu0 %v4451_v2, %s2167_s9  ;;  %v3116_v16 = vsel %vm316_vm0, %v481_v62, %v482_v21  ;;  %v4455_v21 = vld [vmem:[#allocation37_spill] sm:$0xff] }
 0x16a   : > { %v3103_v58 = vpop.permute.xlu2 %752 }
 0x16b   : > { %4452 = vst [vmem:[#allocation131_spill] sm:$0xff] %v3103_v58  ;;  %v3108_v36 = vpop.permute.xlu1 %732  ;;  %v3110_v46 = vpop.permute.xlu0 %730 }
 0x170   : > { %888 = vrot.lane.b32.xlu2 %v2612_v10, %s2168_s10 }
 0x171   : > { %854 = vrot.lane.b32.xlu1 %v3113_v60, %s2167_s9  ;;  %852 = vrot.lane.b32.xlu0 %v3116_v16, %s2167_s9  ;;  %s1723_s9 = scalar_lea.sflag [#allocation3], %s4137_s23 }
 0x172   : > { %v3124_v2 = vpop.permute.xlu2 %758 }
 0x173   : > { %4453 = vst [vmem:[#allocation132_spill] sm:$0xff] %v3124_v2  ;;  %v3126_v58 = vpop.permute.xlu1 %738  ;;  %v3128_v41 = vpop.permute.xlu0 %736  ;;  %v4458_v2 = vld [vmem:[#allocation45_spill] sm:$0xff] }
 0x174   : > { %4454 = vst [vmem:[#allocation133_spill] sm:$0xff] %v3128_v41 }
 0x178   : > { %894 = vrot.lane.b32.xlu2 %v2631_v9, %s2168_s10  ;;  %v4459_v9 = vld [vmem:[#allocation39_spill] sm:$0xff] }
 0x179   : > { %892 = vrot.lane.b32.xlu1 %v2634_v47, %s2168_s10  ;;  %890 = vrot.lane.b32.xlu0 %v4455_v21, %s2168_s10 }
 0x17a   : > { %v3136_v10 = vpop.permute.xlu2 %796 }
 0x17b   : > { %4456 = vst [vmem:[#allocation37_spill] sm:$0xff] %v3136_v10  ;;  %v3138_v62 = vpop.permute.xlu1 %744  ;;  %v3140_v63 = vpop.permute.xlu0 %742  ;;  %v4462_v10 = vld [vmem:[#allocation48_spill] sm:$0xff] }
 0x17c   : > { %4457 = vst [vmem:[#allocation134_spill] sm:$0xff] %v3140_v63  ;;  %v4463_v63 = vld [vmem:[#allocation49_spill] sm:$0xff] }
 0x180   : > { %900 = vrot.lane.b32.xlu2 %v2652_v44, %s2168_s10  ;;  %v4464_v44 = vld [vmem:[#allocation43_spill] sm:$0xff] }
 0x181   : > { %898 = vrot.lane.b32.xlu1 %v4458_v2, %s2168_s10  ;;  %896 = vrot.lane.b32.xlu0 %v4459_v9, %s2168_s10 }
 0x182   : > { %v3148_v41 = vpop.permute.xlu2 %802 }
 0x183   : > { %4460 = vst [vmem:[#allocation135_spill] sm:$0xff] %v3148_v41  ;;  %v3150_v47 = vpop.permute.xlu1 %750  ;;  %v3152_v21 = vpop.permute.xlu0 %748 }
 0x184   : > { %4461 = vst [vmem:[#allocation136_spill] sm:$0xff] %v3152_v21 }
 0x188   : > { %906 = vrot.lane.b32.xlu2 %v4462_v10, %s2168_s10  ;;  %v4468_v10 = vld [vmem:[#allocation47_spill] sm:$0xff] }
 0x189   : > { %904 = vrot.lane.b32.xlu1 %v4463_v63, %s2168_s10  ;;  %902 = vrot.lane.b32.xlu0 %v4464_v44, %s2168_s10 }
 0x18a   : > { %v3160_v17 = vpop.permute.xlu2 %808 }
 0x18b   : > { %4465 = vst [vmem:[#allocation137_spill] sm:$0xff] %v3160_v17  ;;  %v3162_v2 = vpop.permute.xlu1 %756  ;;  %v3164_v9 = vpop.permute.xlu0 %754  ;;  %v4472_v17 = vld [vmem:[#allocation53_spill] sm:$0xff] }
 0x18c   : > { %4466 = vst [vmem:[#allocation138_spill] sm:$0xff] %v3162_v2  ;;  %v4471_v2 = vld [vmem:[#allocation60_spill] sm:$0xff] }
 0x18d   : > { %4467 = vst [vmem:[#allocation139_spill] sm:$0xff] %v3164_v9 }
 0x190   : > { %912 = vrot.lane.b32.xlu2 %v2699_v59, %s2168_s10 }
 0x191   : > { %910 = vrot.lane.b32.xlu1 %v2702_v4, %s2168_s10  ;;  %908 = vrot.lane.b32.xlu0 %v4468_v10, %s2168_s10 }
 0x192   : > { %v3172_v41 = vpop.permute.xlu2 %814 }
 0x193   : > { %4469 = vst [vmem:[#allocation140_spill] sm:$0xff] %v3172_v41  ;;  %v3174_v63 = vpop.permute.xlu1 %794  ;;  %v3176_v44 = vpop.permute.xlu0 %792  ;;  %v4476_v41 = vld [vmem:[#allocation59_spill] sm:$0xff] }
 0x194   : > { %4470 = vst [vmem:[#allocation141_spill] sm:$0xff] %v3176_v44 }
 0x198   : > { %918 = vrot.lane.b32.xlu2 %v2725_v32, %s2168_s10 }
 0x199   : > { %916 = vrot.lane.b32.xlu1 %v4471_v2, %s2168_s10  ;;  %914 = vrot.lane.b32.xlu0 %v4472_v17, %s2168_s10 }
 0x19a   : > { %v3184_v59 = vpop.permute.xlu2 %820 }
 0x19b   : > { %4473 = vst [vmem:[#allocation60_spill] sm:$0xff] %v3184_v59  ;;  %v3186_v4 = vpop.permute.xlu1 %800  ;;  %v3188_v10 = vpop.permute.xlu0 %798  ;;  %v4479_v59 = vld [vmem:[#allocation71_spill] sm:$0xff] }
 0x19c   : > { %4474 = vst [vmem:[#allocation142_spill] sm:$0xff] %v3186_v4 }
 0x19d   : > { %4475 = vst [vmem:[#allocation143_spill] sm:$0xff] %v3188_v10 }
 0x1a0   : > { %924 = vrot.lane.b32.xlu2 %v2750_v7, %s2168_s10  ;;  %v4480_v7 = vld [vmem:[#allocation64_spill] sm:$0xff] }
 0x1a1   : > { %922 = vrot.lane.b32.xlu1 %v2753_v8, %s2168_s10  ;;  %920 = vrot.lane.b32.xlu0 %v4476_v41, %s2168_s10 }
 0x1a2   : > { %v3196_v44 = vpop.permute.xlu2 %826 }
 0x1a3   : > { %v3198_v9 = vpop.permute.xlu1 %806  ;;  %v3200_v17 = vpop.permute.xlu0 %804 }
 0x1a4   : > { %4477 = vst [vmem:[#allocation59_spill] sm:$0xff] %v3198_v9 }
 0x1a5   : > { %4478 = vst [vmem:[#allocation144_spill] sm:$0xff] %v3200_v17 }
 0x1a8   : > { %930 = vrot.lane.b32.xlu2 %v2776_v27, %s2168_s10  ;;  %v4483_v27 = vld [vmem:[#allocation69_spill] sm:$0xff] }
 0x1a9   : > { %928 = vrot.lane.b32.xlu1 %v4479_v59, %s2168_s10  ;;  %926 = vrot.lane.b32.xlu0 %v4480_v7, %s2168_s10 }
 0x1aa   : > { %v3208_v10 = vpop.permute.xlu2 %832 }
 0x1ab   : > { %v3210_v21 = vpop.permute.xlu1 %812  ;;  %v3212_v4 = vpop.permute.xlu0 %810 }
 0x1ac   : > { %4481 = vst [vmem:[#allocation145_spill] sm:$0xff] %v3210_v21  ;;  %v486_v21 = vrot.slane %v2972_v56, 2 }
 0x1ad   : > { %4482 = vst [vmem:[#allocation146_spill] sm:$0xff] %v3212_v4  ;;  %v487_v4 = vrot.slane %v2969_v48, 2 }
 0x1b0   : > { %936 = vrot.lane.b32.xlu2 %v2801_v15, %s2168_s10 }
 0x1b1   : > { %934 = vrot.lane.b32.xlu1 %v2804_v14, %s2168_s10  ;;  %932 = vrot.lane.b32.xlu0 %v4483_v27, %s2168_s10  ;;  %v4486_v14 = vld [vmem:[#allocation75_spill] sm:$0xff] }
 0x1b2   : > { %v3220_v17 = vpop.permute.xlu2 %838 }
 0x1b3   : > { %v3222_v59 = vpop.permute.xlu1 %818  ;;  %v3224_v7 = vpop.permute.xlu0 %816 }
 0x1b4   : > { %4484 = vst [vmem:[#allocation147_spill] sm:$0xff] %v3222_v59 }
 0x1b5   : > { %4485 = vst [vmem:[#allocation148_spill] sm:$0xff] %v3224_v7  ;;  %v3241_v7 = vsel %vm397_vm1, %v486_v21, %v487_v4 }
 0x1b8   : > { %942 = vrot.lane.b32.xlu2 %v2827_v38, %s2168_s10 }
 0x1b9   : > { %940 = vrot.lane.b32.xlu1 %v2830_v51, %s2168_s10  ;;  %938 = vrot.lane.b32.xlu0 %v4486_v14, %s2168_s10  ;;  %v489_v14 = vrot.slane %v3095_v5, 2 }
 0x1ba   : > { %v3234_v27 = vpop.permute.xlu2 %844 }
 0x1bb   : > { %v3236_v15 = vpop.permute.xlu1 %824  ;;  %v3238_v59 = vpop.permute.xlu0 %822  ;;  %v3257_v21 = vsel %vm397_vm1, %v487_v4, %v489_v14  ;;  %v266_v14 = vld [vmem:[%s2252_s5 + $0x1a0] sm:$0xff] }
 0x1c0   : > { %948 = vrot.lane.b32.xlu2 %v3241_v7, %s2168_s10 }
 0x1c1   : > { %946 = vrot.lane.b32.xlu1 %v2846_v55, %s2168_s10  ;;  %944 = vrot.lane.b32.xlu0 %v2824_v40, %s2168_s10 }
 0x1c2   : > { %v3249_v51 = vpop.permute.xlu2 %850 }
 0x1c3   : > { %4487 = vst [vmem:[#allocation149_spill] sm:$0xff] %v3249_v51  ;;  %v3252_v38 = vpop.permute.xlu1 %830  ;;  %v3254_v9 = vpop.permute.xlu0 %828 }
 0x1c8   : > { %986 = vrot.lane.b32.xlu2 %v2258_v1, %s2169_s11 }
 0x1c9   : > { %984 = vrot.lane.b32.xlu1 %v2255_v0, %s2169_s11  ;;  %950 = vrot.lane.b32.xlu0 %v3257_v21, %s2168_s10  ;;  %s2054_s10 = sshra.s32 %s1749_s8, 4  ;;  %s2055_s10 = int_to_ptr.hbm [resolvable:$true] %s2054_s10 }
 0x1ca   : > { %v3265_v40 = vpop.permute.xlu2 %888  ;;  %p2061_p0 = scmp.lt.s32.totalorder %s2055_s10, %s4212_s2 }
 0x1cb   : > { %4488 = vst [vmem:[#allocation150_spill] sm:$0xff] %v3265_v40  ;;  %v3267_v5 = vpop.permute.xlu1 %836  ;;  %v3269_v51 = vpop.permute.xlu0 %834 }
 0x1d0   : > { %992 = vrot.lane.b32.xlu2 %v2310_v24, %s2169_s11 }
 0x1d1   : > { %990 = vrot.lane.b32.xlu1 %v2316_v26, %s2169_s11  ;;  %988 = vrot.lane.b32.xlu0 %v2322_v28, %s2169_s11 }
 0x1d2   : > { %v3277_v0 = vpop.permute.xlu2 %894 }
 0x1d3   : > { %4489 = vst [vmem:[#allocation151_spill] sm:$0xff] %v3277_v0  ;;  %v3279_v1 = vpop.permute.xlu1 %842  ;;  %v3281_v4 = vpop.permute.xlu0 %840  ;;  %v267_v0 = vld [vmem:[%s2252_s5 + $0x1a8] sm:$0x3] }
 0x1d8   : > { %998 = vrot.lane.b32.xlu2 %v2344_v37, %s2169_s11  ;;  %v495_v37 = vrot.slane %v266_v14, 1 }
 0x1d9   : > { %996 = vrot.lane.b32.xlu1 %v2350_v39, %s2169_s11  ;;  %994 = vrot.lane.b32.xlu0 %v2313_v25, %s2169_s11  ;;  %v497_v39 = vrot.slane %v267_v0, 1 }
 0x1da   : > { %v3289_v24 = vpop.permute.xlu2 %900 }
 0x1db   : > { %4490 = vst [vmem:[#allocation152_spill] sm:$0xff] %v3289_v24  ;;  %v3291_v26 = vpop.permute.xlu1 %848  ;;  %v3293_v28 = vpop.permute.xlu0 %846 }
 0x1dc   : > { %4491 = vst [vmem:[#allocation153_spill] sm:$0xff] %v3291_v26  ;;  %v498_v26 = vsel %vm316_vm0, %v495_v37, %v497_v39  ;;  %v265_v39 = vld [vmem:[%s2252_s5 + $0x198] sm:$0xff] }
 0x1e0   : > { %1014 = vrot.lane.b32.xlu2 %v2447_v23, %s2169_s11  ;;  %v502_v23 = vrot.slane %v267_v0, 2 }
 0x1e1   : > { %1002 = vrot.lane.b32.xlu1 %v2381_v50, %s2169_s11  ;;  %1000 = vrot.lane.b32.xlu0 %v2387_v52, %s2169_s11  ;;  %v500_v52 = vrot.slane %v266_v14, 2 }
 0x1e2   : > { %v3303_v25 = vpop.permute.xlu2 %906 }
 0x1e3   : > { %4492 = vst [vmem:[#allocation154_spill] sm:$0xff] %v3303_v25  ;;  %v3305_v24 = vpop.permute.xlu1 %854  ;;  %v3307_v40 = vpop.permute.xlu0 %852 }
 0x1e4   : > { %4493 = vst [vmem:[#allocation155_spill] sm:$0xff] %v3307_v40  ;;  %v503_v40 = vsel %vm397_vm1, %v500_v52, %v502_v23 }
 0x1e8   : > { %1142 = vrot.lane.b32.xlu2 %v498_v26, %s2170_s12  ;;  %v1288_v26 = vsel %vm1272_vm2, %v2378_v49, %v2821_v12 }
 0x1e9   : > { %1110 = vrot.lane.b32.xlu1 %v4429_v22, %s2170_s12  ;;  %1046 = vrot.lane.b32.xlu0 %v266_v14, %s2169_s11  ;;  %v1321_v22 = vsel %vm1305_vm3, %v1288_v26, %v2914_v29  ;;  %v494_v14 = vrot.slane %v265_v39, 1 }
 0x1ea   : > { %v3314_v50 = vpop.permute.xlu2 %912  ;;  %v1354_v0 = vsel %vm1338_vm4, %v1321_v22, %v3090_v13 }
 0x1eb   : > { %v3316_v55 = vpop.permute.xlu1 %892  ;;  %v3318_v25 = vpop.permute.xlu0 %890  ;;  %v1387_v49 = vsel %vm1371_vm5, %v1354_v0, %v3238_v59  ;;  %v496_v13 = vsel %vm316_vm0, %v494_v14, %v495_v37  ;;  %v499_v0 = vrot.slane %v265_v39, 2 }
 0x1f0   : > { %1012 = vrot.lane.b32.xlu2 %v2453_v30, %s2169_s11 }
 0x1f1   : > { %1238 = vrot.lane.b32.xlu1 %v503_v40, %s2171_s13  ;;  %1206 = vrot.lane.b32.xlu0 %v2753_v8, %s2171_s13  ;;  %v1291_v40 = vsel %vm1272_vm2, %v2453_v30, %v2843_v57 }
 0x1f2   : > { %v919_v12 = vpop.permute.xlu2 %918  ;;  %v1324_v8 = vsel %vm1305_vm3, %v1291_v40, %v2926_v45  ;;  %v501_v45 = vsel %vm397_vm1, %v499_v0, %v500_v52  ;;  %v3450_v0 = vld [vmem:[%s2252_s5 + $0xf0] sm:$0xff] }
 0x1f3   : > { %v3336_v29 = vpop.permute.xlu1 %898  ;;  %v3339_v23 = vsel %vm1404_vm6, %v1387_v49, %v919_v12  ;;  %v3341_v26 = vpop.permute.xlu0 %896  ;;  %v1357_v59 = vsel %vm1338_vm4, %v1324_v8, %v3108_v36 }
 0x1f4   : > { %v1390_v37 = vsel %vm1371_vm5, %v1357_v59, %v3254_v9 }
 0x1f8   : > { %1140 = vrot.lane.b32.xlu2 %v496_v13, %s2170_s12  ;;  %v4495_v13 = vld [vmem:[#allocation79_spill] sm:$0xff] }
 0x1f9   : > { %1108 = vrot.lane.b32.xlu1 %v4430_v35, %s2170_s12  ;;  %1044 = vrot.lane.b32.xlu0 %v265_v39, %s2169_s11  ;;  %v1294_v35 = vsel %vm1272_vm2, %v2444_v20, %v2858_v18 }
 0x1fa   : > { %v925_v22 = vpop.permute.xlu2 %924  ;;  %v1327_v36 = vsel %vm1305_vm3, %v1294_v35, %v2938_v19  ;;  %v4497_v35 = vld [vmem:[#allocation84_spill] sm:$0xff] }
 0x1fb   : > { %v3357_v14 = vpop.permute.xlu1 %904  ;;  %v3360_v30 = vsel %vm1404_vm6, %v1390_v37, %v925_v22  ;;  %v3362_v57 = vpop.permute.xlu0 %902  ;;  %v1360_v9 = vsel %vm1338_vm4, %v1327_v36, %v3126_v58  ;;  %v1297_v58 = vsel %vm1272_vm2, %v2519_v6, %v2870_v53  ;;  %v4498_v36 = vld [vmem:[#allocation107_spill] sm:$0xff] }
 0x1fc   : > { %v1393_v52 = vsel %vm1371_vm5, %v1360_v9, %v3269_v51  ;;  %v1330_v19 = vsel %vm1305_vm3, %v1297_v58, %v2950_v54  ;;  %v4500_v58 = vld [vmem:[#allocation21_spill] sm:$0xff] }
 0x1fd   : > { %v1363_v51 = vsel %vm1338_vm4, %v1330_v19, %v3138_v62  ;;  %v2009_v62 = vld [vmem:[%s2252_s5 + $0xc8] sm:$0xff]  ;;  %v4501_v19 = vld [vmem:[#allocation20_spill] sm:$0xff] }
 0x200   : > { %1010 = vrot.lane.b32.xlu2 %v2410_v61, %s2169_s11 }
 0x201   : > { %1236 = vrot.lane.b32.xlu1 %v501_v45, %s2171_s13  ;;  %1204 = vrot.lane.b32.xlu0 %v4476_v41, %s2171_s13  ;;  %v1396_v41 = vsel %vm1371_vm5, %v1363_v51, %v3281_v4  ;;  %v2012_v45 = vld [vmem:[%s2252_s5 + $0xe0] sm:$0xff] }
 0x202   : > { %v931_v39 = vpop.permute.xlu2 %930 }
 0x203   : > { %v3379_v20 = vpop.permute.xlu1 %910  ;;  %v3382_v18 = vsel %vm1404_vm6, %v1393_v52, %v931_v39  ;;  %v3384_v61 = vpop.permute.xlu0 %908  ;;  %v4499_v52 = vld [vmem:[#allocation108_spill] sm:$0xff] }
 0x208   : > { %1138 = vrot.lane.b32.xlu2 %v3113_v60, %s2170_s12  ;;  %v1300_v60 = vsel %vm1272_vm2, %v2510_v43, %v2882_v33 }
 0x209   : > { %1106 = vrot.lane.b32.xlu1 %v4431_v34, %s2170_s12  ;;  %1042 = vrot.lane.b32.xlu0 %v2969_v48, %s2169_s11  ;;  %v4494_v34 = vld [vmem:[#allocation61_spill] sm:$0xff]  ;;  %v1333_v40 = vsel %vm1305_vm3, %v1300_v60, %v2962_v3 }
 0x20a   : > { %v937_v49 = vpop.permute.xlu2 %936  ;;  %v1290_v12 = vsel %vm1272_vm2, %v2009_v62, %v4494_v34  ;;  %v2010_v48 = vld [vmem:[%s2252_s5 + $0xc0] sm:$0xff]  ;;  %v1366_v33 = vsel %vm1338_vm4, %v1333_v40, %v3150_v47 }
 0x20b   : > { %v3401_v6 = vpop.permute.xlu1 %916  ;;  %v3404_v53 = vsel %vm1404_vm6, %v1396_v41, %v937_v49  ;;  %v3406_v54 = vpop.permute.xlu0 %914  ;;  %v1289_v4 = vsel %vm1272_vm2, %v2010_v48, %v4495_v13  ;;  %v1323_v8 = vsel %vm1305_vm3, %v1290_v12, %v2964_v42  ;;  %v1399_v59 = vsel %vm1371_vm5, %v1366_v33, %v3293_v28  ;;  %v4496_v28 = vld [vmem:[#allocation66_spill] sm:$0xff]  ;;  %v4502_v41 = vld [vmem:[#allocation133_spill] sm:$0xff]  ;;  %v3490_v33 = vld [vmem:[%s2252_s5 + $0x110] sm:$0xff] }
 0x20c   : > { %v1322_v43 = vsel %vm1305_vm3, %v1289_v4, %v2966_v11  ;;  %v1356_v42 = vsel %vm1338_vm4, %v1323_v8, %v3110_v46  ;;  %v2013_v13 = vld [vmem:[%s2252_s5 + $0x8] sm:$0xff]  ;;  %v4504_v8 = vld [vmem:[#allocation97_spill] sm:$0xff] }
 0x20d   : > { %v1355_v3 = vsel %vm1338_vm4, %v1322_v43, %v3052_v31  ;;  %v1389_v47 = vsel %vm1371_vm5, %v1356_v42, %v3196_v44  ;;  %v1293_v44 = vsel %vm1272_vm2, %v3450_v0, %v4496_v28  ;;  %v4503_v4 = vld [vmem:[#allocation58_spill] sm:$0xff]  ;;  %v4506_v42 = vld [vmem:[#allocation87_spill] sm:$0xff] }
 0x20e   : > { %v1388_v37 = vsel %vm1371_vm5, %v1355_v3, %v3236_v15  ;;  %v1292_v15 = vsel %vm1272_vm2, %v2012_v45, %v4497_v35  ;;  %v1326_v9 = vsel %vm1305_vm3, %v1293_v44, %v4498_v36  ;;  %v1274_v40 = vsel %vm1272_vm2, %v2013_v13, %v4503_v4  ;;  %v3496_v3 = vld [vmem:[%s2252_s5 + $0x108] sm:$0xff]  ;;  %v4509_v28 = vld [vmem:[#allocation111_spill] sm:$0xff]  ;;  %v4515_v4 = vld [vmem:[#allocation89_spill] sm:$0xff] }
 0x20f   : > { %v1325_v39 = vsel %vm1305_vm3, %v1292_v15, %v4499_v52  ;;  %v1307_v43 = vsel %vm1305_vm3, %v1274_v40, %v4504_v8  ;;  %v4510_v35 = vld [vmem:[#allocation126_spill] sm:$0xff]  ;;  %v4516_v8 = vld [vmem:[#allocation112_spill] sm:$0xff] }
 0x210   : > { %1008 = vrot.lane.b32.xlu2 %v2010_v48, %s2169_s11  ;;  %v1358_v51 = vsel %vm1338_vm4, %v1325_v39, %v4501_v19  ;;  %v4511_v36 = vld [vmem:[#allocation134_spill] sm:$0xff] }
 0x211   : > { %1234 = vrot.lane.b32.xlu1 %v3257_v21, %s2171_s13  ;;  %1202 = vrot.lane.b32.xlu0 %v2725_v32, %s2171_s13  ;;  %v1391_v62 = vsel %vm1371_vm5, %v1358_v51, %v3252_v38  ;;  %v3546_v13 = vld [vmem:[%s2252_s5 + $0x128] sm:$0xff] }
 0x212   : > { %v943_v11 = vpop.permute.xlu2 %942  ;;  %v1298_v40 = vsel %vm1272_vm2, %v3546_v13, %v4515_v4 }
 0x213   : > { %v923_v21 = vpop.permute.xlu1 %922  ;;  %v3441_v22 = vsel %vm1404_vm6, %v1399_v59, %v943_v11  ;;  %v921_v32 = vpop.permute.xlu0 %920  ;;  %v1295_v59 = vsel %vm1272_vm2, %v3496_v3, %v4506_v42  ;;  %v4507_v11 = vld [vmem:[#allocation109_spill] sm:$0xff] }
 0x214   : > { %v3444_v31 = vsel %vm1404_vm6, %v1389_v47, %v923_v21  ;;  %v3447_v46 = vsel %vm1404_vm6, %v1388_v37, %v921_v32  ;;  %v1340_v47 = vsel %vm1338_vm4, %v1307_v43, %v4507_v11  ;;  %v2016_v37 = vld [vmem:[%s2252_s5 + $0xb0] sm:$0xff]  ;;  %v4508_v21 = vld [vmem:[#allocation110_spill] sm:$0xff]  ;;  %v1328_v44 = vsel %vm1305_vm3, %v1295_v59, %v4509_v28  ;;  %v4522_v28 = vld [vmem:[#allocation129_spill] sm:$0xff] }
 0x215   : > { %v1373_v45 = vsel %vm1371_vm5, %v1340_v47, %v3174_v63  ;;  %v1361_v15 = vsel %vm1338_vm4, %v1328_v44, %v4510_v35  ;;  %v4519_v59 = vld [vmem:[#allocation114_spill] sm:$0xff] }
 0x216   : > { %v1406_v52 = vsel %vm1404_vm6, %v1373_v45, %v3318_v25  ;;  %v2017_v25 = vld [vmem:[%s2252_s5 + $0x30] sm:$0xff]  ;;  %v1331_v11 = vsel %vm1305_vm3, %v1298_v40, %v4519_v59  ;;  %v4520_v47 = vld [vmem:[#allocation142_spill] sm:$0xff]  ;;  %v4523_v45 = vld [vmem:[#allocation136_spill] sm:$0xff] }
 0x217   : > { %v1364_v44 = vsel %vm1338_vm4, %v1331_v11, %v4522_v28  ;;  %v4528_v40 = vld [vmem:[#allocation115_spill] sm:$0xff] }
 0x218   : > { %1136 = vrot.lane.b32.xlu2 %v3116_v16, %s2170_s12  ;;  %v1359_v16 = vsel %vm1338_vm4, %v1326_v9, %v4502_v41  ;;  %v4531_v11 = vld [vmem:[#allocation59_spill] sm:$0xff] }
 0x219   : > { %1104 = vrot.lane.b32.xlu1 %v4500_v58, %s2170_s12  ;;  %1040 = vrot.lane.b32.xlu0 %v2972_v56, %s2169_s11  ;;  %v1392_v60 = vsel %vm1371_vm5, %v1359_v16, %v3208_v10  ;;  %v4505_v10 = vld [vmem:[#allocation72_spill] sm:$0xff]  ;;  %v4512_v16 = vld [vmem:[#allocation38_spill] sm:$0xff]  ;;  %v4534_v28 = vld [vmem:[#allocation131_spill] sm:$0xff] }
 0x21a   : > { %v3472_v49 = vpop.permute.xlu2 %948  ;;  %v1296_v38 = vsel %vm1272_vm2, %v3490_v33, %v4505_v10  ;;  %v4517_v10 = vld [vmem:[#allocation35_spill] sm:$0xff] }
 0x21b   : > { %v929_v34 = vpop.permute.xlu1 %928  ;;  %v927_v12 = vpop.permute.xlu0 %926  ;;  %v1329_v32 = vsel %vm1305_vm3, %v1296_v38, %v4508_v21  ;;  %v4518_v38 = vld [vmem:[#allocation113_spill] sm:$0xff]  ;;  %v4521_v21 = vld [vmem:[#allocation22_spill] sm:$0xff] }
 0x21c   : > { %v3479_v48 = vsel %vm1404_vm6, %v1392_v60, %v929_v34  ;;  %v3482_v56 = vsel %vm1404_vm6, %v1391_v62, %v927_v12  ;;  %v1362_v9 = vsel %vm1338_vm4, %v1329_v32, %v4511_v36  ;;  %v1277_v60 = vsel %vm1272_vm2, %v2017_v25, %v4512_v16  ;;  %v4514_v34 = vld [vmem:[#allocation78_spill] sm:$0xff]  ;;  %v3564_v32 = vld [vmem:[%s2252_s5 + $0x170] sm:$0xff] }
 0x21d   : > { %v1395_v63 = vsel %vm1371_vm5, %v1362_v9, %v3220_v17  ;;  %v4513_v17 = vld [vmem:[#allocation99_spill] sm:$0xff]  ;;  %v4524_v25 = vld [vmem:[#allocation62_spill] sm:$0xff] }
 0x21e   : > { %v1310_v62 = vsel %vm1305_vm3, %v1277_v60, %v4513_v17  ;;  %v4525_v60 = vld [vmem:[#allocation101_spill] sm:$0xff]  ;;  %v2022_v17 = vld [vmem:[%s2252_s5 + $0x158] sm:$0xff] }
 0x21f   : > { %v1343_v43 = vsel %vm1338_vm4, %v1310_v62, %v4516_v8 }
 0x220   : > { %1006 = vrot.lane.b32.xlu2 %v2016_v37, %s2169_s11  ;;  %v1376_v37 = vsel %vm1371_vm5, %v1343_v43, %v4520_v47  ;;  %v3604_v43 = vld [vmem:[%s2252_s5 + $0xa8] sm:$0xff] }
 0x221   : > { %1232 = vrot.lane.b32.xlu1 %v3241_v7, %s2171_s13  ;;  %1200 = vrot.lane.b32.xlu0 %v4471_v2, %s2171_s13  ;;  %v1394_v7 = vsel %vm1371_vm5, %v1361_v15, %v3267_v5  ;;  %v3540_v5 = vld [vmem:[%s2252_s5 + $0x138] sm:$0xff]  ;;  %v1409_v15 = vsel %vm1404_vm6, %v1376_v37, %v3341_v26  ;;  %v2021_v26 = vld [vmem:[%s2252_s5 + $0x50] sm:$0xff]  ;;  %v4532_v37 = vld [vmem:[#allocation85_spill] sm:$0xff] }
 0x222   : > { %v987_v39 = vpop.permute.xlu2 %986  ;;  %v1299_v12 = vsel %vm1272_vm2, %v3540_v5, %v4514_v34  ;;  %v1280_v16 = vsel %vm1272_vm2, %v2021_v26, %v4524_v25  ;;  %v3596_v34 = vld [vmem:[%s2252_s5 + $0x150] sm:$0xff] }
 0x223   : > { %v935_v58 = vpop.permute.xlu1 %934  ;;  %v3526_v2 = vsel %vm1437_vm7, %v1406_v52, %v987_v39  ;;  %v933_v19 = vpop.permute.xlu0 %932  ;;  %v1332_v42 = vsel %vm1305_vm3, %v1299_v12, %v4518_v38  ;;  %v1397_v52 = vsel %vm1371_vm5, %v1364_v44, %v3279_v1  ;;  %v4526_v1 = vld [vmem:[#allocation83_spill] sm:$0xff] }
 0x224   : > { %v3529_v51 = vsel %vm1404_vm6, %v1395_v63, %v935_v58  ;;  %v3532_v41 = vsel %vm1404_vm6, %v1394_v7, %v933_v19  ;;  %v1365_v35 = vsel %vm1338_vm4, %v1332_v42, %v4523_v45  ;;  %v1302_v62 = vsel %vm1272_vm2, %v2022_v17, %v4526_v1  ;;  %v4527_v12 = vld [vmem:[#allocation91_spill] sm:$0xff]  ;;  %v4530_v42 = vld [vmem:[#allocation117_spill] sm:$0xff]  ;;  %v4538_v1 = vld [vmem:[#allocation52_spill] sm:$0xff] }
 0x225   : > { %v1398_v9 = vsel %vm1371_vm5, %v1365_v35, %v3234_v27  ;;  %v1313_v27 = vsel %vm1305_vm3, %v1280_v16, %v4525_v60  ;;  %v1301_v4 = vsel %vm1272_vm2, %v3596_v34, %v4527_v12  ;;  %v4535_v45 = vld [vmem:[#allocation139_spill] sm:$0xff]  ;;  %v4539_v12 = vld [vmem:[#allocation86_spill] sm:$0xff] }
 0x226   : > { %v1346_v8 = vsel %vm1338_vm4, %v1313_v27, %v4528_v40  ;;  %v1334_v59 = vsel %vm1305_vm3, %v1301_v4, %v4530_v42  ;;  %v4540_v40 = vld [vmem:[#allocation36_spill] sm:$0xff]  ;;  %v3649_v42 = vld [vmem:[%s2252_s5 + $0x168] sm:$0xff] }
 0x227   : > { %v1379_v47 = vsel %vm1371_vm5, %v1346_v8, %v4531_v11  ;;  %v1367_v44 = vsel %vm1338_vm4, %v1334_v59, %v4534_v28  ;;  %v4541_v8 = vld [vmem:[#allocation119_spill] sm:$0xff]  ;;  %v4543_v59 = vld [vmem:[#allocation141_spill] sm:$0xff] }
 0x228   : > { %1134 = vrot.lane.b32.xlu2 %v4517_v10, %s2170_s12  ;;  %v4529_v10 = vld [vmem:[#allocation116_spill] sm:$0xff] }
 0x229   : > { %1102 = vrot.lane.b32.xlu1 %v4521_v21, %s2170_s12  ;;  %1038 = vrot.lane.b32.xlu0 %v3564_v32, %s2169_s11  ;;  %v1335_v38 = vsel %vm1305_vm3, %v1302_v62, %v4529_v10  ;;  %v4533_v21 = vld [vmem:[#allocation53_spill] sm:$0xff] }
 0x22a   : > { %v993_v36 = vpop.permute.xlu2 %992  ;;  %v1368_v35 = vsel %vm1338_vm4, %v1335_v38, %v4535_v45  ;;  %v4542_v38 = vld [vmem:[#allocation17_spill] sm:$0xff] }
 0x22b   : > { %v941_v39 = vpop.permute.xlu1 %940  ;;  %v3579_v63 = vsel %vm1437_vm7, %v1409_v15, %v993_v36  ;;  %v939_v7 = vpop.permute.xlu0 %938  ;;  %v1412_v15 = vsel %vm1404_vm6, %v1379_v47, %v3362_v57  ;;  %v2025_v57 = vld [vmem:[%s2252_s5] sm:$0xff] }
 0x22c   : > { %v3582_v58 = vsel %vm1404_vm6, %v1398_v9, %v941_v39  ;;  %v3585_v19 = vsel %vm1404_vm6, %v1397_v52, %v939_v7  ;;  %v4536_v9 = vld [vmem:[#allocation149_spill] sm:$0xff]  ;;  %v1273_v62 = vsel %vm1272_vm2, %v2025_v57, %v4538_v1  ;;  %v4549_v1 = vld [vmem:[#allocation122_spill] sm:$0xff] }
 0x22d   : > { %v1401_v52 = vsel %vm1371_vm5, %v1368_v35, %v4536_v9  ;;  %v4537_v39 = vld [vmem:[#allocation153_spill] sm:$0xff]  ;;  %v1306_v4 = vsel %vm1305_vm3, %v1273_v62, %v4539_v12  ;;  %v2027_v35 = vld [vmem:[%s2252_s5 + $0x18] sm:$0xff]  ;;  %v4550_v12 = vld [vmem:[#allocation123_spill] sm:$0xff] }
 0x22e   : > { %v1400_v7 = vsel %vm1371_vm5, %v1367_v44, %v4537_v39  ;;  %v1339_v10 = vsel %vm1338_vm4, %v1306_v4, %v4541_v8  ;;  %v2028_v9 = vld [vmem:[%s2252_s5 + $0x20] sm:$0xff]  ;;  %v4552_v8 = vld [vmem:[#allocation54_spill] sm:$0xff] }
 0x22f   : > { %v1372_v11 = vsel %vm1371_vm5, %v1339_v10, %v4543_v59  ;;  %v4553_v10 = vld [vmem:[#allocation37_spill] sm:$0xff]  ;;  %v4554_v59 = vld [vmem:[#allocation143_spill] sm:$0xff] }
 0x230   : > { %1004 = vrot.lane.b32.xlu2 %v3604_v43, %s2169_s11 }
 0x231   : > { %1230 = vrot.lane.b32.xlu1 %v4532_v37, %s2171_s13  ;;  %1198 = vrot.lane.b32.xlu0 %v4533_v21, %s2171_s13  ;;  %v4544_v37 = vld [vmem:[#allocation150_spill] sm:$0xff] }
 0x232   : > { %v999_v36 = vpop.permute.xlu2 %998  ;;  %v1405_v21 = vsel %vm1404_vm6, %v1372_v11, %v4544_v37  ;;  %v4555_v37 = vld [vmem:[#allocation151_spill] sm:$0xff] }
 0x233   : > { %v947_v26 = vpop.permute.xlu1 %946  ;;  %v3629_v25 = vsel %vm1437_vm7, %v1412_v15, %v999_v36  ;;  %v945_v16 = vpop.permute.xlu0 %944  ;;  %v4545_v15 = vld [vmem:[#allocation51_spill] sm:$0xff] }
 0x234   : > { %v3632_v60 = vsel %vm1404_vm6, %v1401_v52, %v947_v26  ;;  %v3635_v27 = vsel %vm1404_vm6, %v1400_v7, %v945_v16  ;;  %v1275_v36 = vsel %vm1272_vm2, %v2027_v35, %v4545_v15  ;;  %v4546_v52 = vld [vmem:[#allocation57_spill] sm:$0xff]  ;;  %v4547_v7 = vld [vmem:[#allocation88_spill] sm:$0xff] }
 0x235   : > { %v1276_v39 = vsel %vm1272_vm2, %v2028_v9, %v4546_v52  ;;  %v4548_v16 = vld [vmem:[#allocation96_spill] sm:$0xff] }
 0x236   : > { %v1309_v26 = vsel %vm1305_vm3, %v1276_v39, %v4547_v7  ;;  %v1308_v57 = vsel %vm1305_vm3, %v1275_v36, %v4548_v16  ;;  %v2029_v52 = vld [vmem:[%s2252_s5 + $0x38] sm:$0xff]  ;;  %v4556_v39 = vld [vmem:[#allocation42_spill] sm:$0xff]  ;;  %v4557_v16 = vld [vmem:[#allocation63_spill] sm:$0xff] }
 0x237   : > { %v1342_v62 = vsel %vm1338_vm4, %v1309_v26, %v4549_v1  ;;  %v1341_v4 = vsel %vm1338_vm4, %v1308_v57, %v4550_v12  ;;  %v1278_v7 = vsel %vm1272_vm2, %v2029_v52, %v4556_v39  ;;  %v2030_v26 = vld [vmem:[%s2252_s5 + $0x48] sm:$0xff]  ;;  %v4567_v52 = vld [vmem:[#allocation152_spill] sm:$0xff] }
 0x238   : > { %1132 = vrot.lane.b32.xlu2 %v4540_v40, %s2170_s12  ;;  %v4551_v40 = vld [vmem:[#allocation80_spill] sm:$0xff]  ;;  %v1375_v11 = vsel %vm1371_vm5, %v1342_v62, %v4554_v59  ;;  %v1279_v57 = vsel %vm1272_vm2, %v2030_v26, %v4557_v16  ;;  %v4558_v1 = vld [vmem:[#allocation90_spill] sm:$0xff] }
 0x239   : > { %1100 = vrot.lane.b32.xlu1 %v4542_v38, %s2170_s12  ;;  %1036 = vrot.lane.b32.xlu0 %v3649_v42, %s2169_s11  ;;  %v1374_v38 = vsel %vm1371_vm5, %v1341_v4, %v4553_v10  ;;  %v1312_v62 = vsel %vm1305_vm3, %v1279_v57, %v4558_v1  ;;  %v4560_v4 = vld [vmem:[#allocation55_spill] sm:$0xff]  ;;  %v4562_v10 = vld [vmem:[#allocation25_spill] sm:$0xff]  ;;  %v4563_v59 = vld [vmem:[#allocation32_spill] sm:$0xff] }
 0x23a   : > { %v3655_v47 = vpop.permute.xlu2 %1014 }
 0x23b   : > { %v985_v28 = vpop.permute.xlu1 %984  ;;  %v3659_v44 = vpop.permute.xlu0 %950 }
 0x23c   : > { %v3662_v45 = vsel %vm1437_vm7, %v1405_v21, %v985_v28  ;;  %v1408_v21 = vsel %vm1404_vm6, %v1375_v11, %v4555_v37  ;;  %v1407_v28 = vsel %vm1404_vm6, %v1374_v38, %v3316_v55  ;;  %v4559_v55 = vld [vmem:[#allocation98_spill] sm:$0xff]  ;;  %v4565_v37 = vld [vmem:[#allocation135_spill] sm:$0xff] }
 0x23d   : > { %v1311_v12 = vsel %vm1305_vm3, %v1278_v7, %v4559_v55  ;;  %v4564_v11 = vld [vmem:[#allocation18_spill] sm:$0xff] }
 0x23e   : > { %v1344_v38 = vsel %vm1338_vm4, %v1311_v12, %v4562_v10  ;;  %v4568_v55 = vld [vmem:[#allocation46_spill] sm:$0xff]  ;;  %v4570_v10 = vld [vmem:[#allocation92_spill] sm:$0xff] }
 0x240   : > { %1034 = vrot.lane.b32.xlu2 %v2022_v17, %s2169_s11 }
 0x241   : > { %1228 = vrot.lane.b32.xlu1 %v4551_v40, %s2171_s13  ;;  %1196 = vrot.lane.b32.xlu0 %v4552_v8, %s2171_s13  ;;  %v4561_v40 = vld [vmem:[#allocation24_spill] sm:$0xff] }
 0x242   : > { %v3687_v17 = vpop.permute.xlu2 %1142  ;;  %v1345_v8 = vsel %vm1338_vm4, %v1312_v62, %v4561_v40  ;;  %v2031_v62 = vld [vmem:[%s2252_s5 + $0x60] sm:$0xff]  ;;  %v4569_v40 = vld [vmem:[#allocation68_spill] sm:$0xff] }
 0x243   : > { %v991_v35 = vpop.permute.xlu1 %990  ;;  %v989_v15 = vpop.permute.xlu0 %988  ;;  %v1281_v12 = vsel %vm1272_vm2, %v2031_v62, %v4568_v55  ;;  %v4578_v55 = vld [vmem:[#allocation154_spill] sm:$0xff] }
 0x244   : > { %v3694_v36 = vsel %vm1437_vm7, %v1408_v21, %v991_v35  ;;  %v3697_v9 = vsel %vm1437_vm7, %v1407_v28, %v989_v15  ;;  %v1377_v21 = vsel %vm1371_vm5, %v1344_v38, %v4565_v37  ;;  %v4566_v28 = vld [vmem:[#allocation144_spill] sm:$0xff] }
 0x245   : > { %v1378_v35 = vsel %vm1371_vm5, %v1345_v8, %v4566_v28  ;;  %v1410_v7 = vsel %vm1404_vm6, %v1377_v21, %v3336_v29  ;;  %v4571_v29 = vld [vmem:[#allocation100_spill] sm:$0xff]  ;;  %v4574_v28 = vld [vmem:[#allocation125_spill] sm:$0xff] }
 0x246   : > { %v1411_v39 = vsel %vm1404_vm6, %v1378_v35, %v4567_v52  ;;  %v4573_v37 = vld [vmem:[#allocation124_spill] sm:$0xff]  ;;  %v4575_v52 = vld [vmem:[#allocation81_spill] sm:$0xff] }
 0x248   : > { %1194 = vrot.lane.b32.xlu2 %v4560_v4, %s2171_s13  ;;  %v2032_v4 = vld [vmem:[%s2252_s5 + $0x68] sm:$0xff] }
 0x249   : > { %1130 = vrot.lane.b32.xlu1 %v4563_v59, %s2170_s12  ;;  %1098 = vrot.lane.b32.xlu0 %v4564_v11, %s2170_s12  ;;  %v1282_v8 = vsel %vm1272_vm2, %v2032_v4, %v4569_v40  ;;  %v1314_v59 = vsel %vm1305_vm3, %v1281_v12, %v4571_v29  ;;  %v4572_v11 = vld [vmem:[#allocation19_spill] sm:$0xff] }
 0x24a   : > { %v3723_v15 = vpop.permute.xlu2 %1012  ;;  %v1315_v38 = vsel %vm1305_vm3, %v1282_v8, %v4570_v10  ;;  %v1347_v35 = vsel %vm1338_vm4, %v1314_v59, %v4574_v28  ;;  %v4580_v29 = vld [vmem:[#allocation47_spill] sm:$0xff]  ;;  %v4581_v59 = vld [vmem:[#allocation33_spill] sm:$0xff] }
 0x24b   : > { %v997_v26 = vpop.permute.xlu1 %996  ;;  %v995_v16 = vpop.permute.xlu0 %994  ;;  %v1348_v21 = vsel %vm1338_vm4, %v1315_v38, %v4573_v37  ;;  %v4579_v38 = vld [vmem:[#allocation82_spill] sm:$0xff] }
 0x24c   : > { %v3730_v57 = vsel %vm1437_vm7, %v1411_v39, %v997_v26  ;;  %v3733_v1 = vsel %vm1437_vm7, %v1410_v7, %v995_v16  ;;  %v4576_v39 = vld [vmem:[#allocation137_spill] sm:$0xff]  ;;  %v4577_v26 = vld [vmem:[#allocation146_spill] sm:$0xff] }
 0x24d   : > { %v1380_v7 = vsel %vm1371_vm5, %v1347_v35, %v4576_v39  ;;  %v1381_v16 = vsel %vm1371_vm5, %v1348_v21, %v4577_v26  ;;  %v4583_v35 = vld [vmem:[#allocation120_spill] sm:$0xff] }
 0x24e   : > { %v1414_v12 = vsel %vm1404_vm6, %v1381_v16, %v4578_v55  ;;  %v1413_v4 = vsel %vm1404_vm6, %v1380_v7, %v3357_v14  ;;  %v4582_v14 = vld [vmem:[#allocation93_spill] sm:$0xff]  ;;  %v4584_v39 = vld [vmem:[#allocation132_spill] sm:$0xff] }
 0x24f   : > { %v1304_v37 = vsel %vm1272_vm2, %v3564_v32, %v4582_v14  ;;  %v4586_v32 = vld [vmem:[#allocation14_spill] sm:$0xff] }
 0x250   : > { %1096 = vrot.lane.b32.xlu2 %v4572_v11, %s2170_s12 }
 0x251   : > { %1032 = vrot.lane.b32.xlu1 %v3596_v34, %s2169_s11  ;;  %1226 = vrot.lane.b32.xlu0 %v4575_v52, %s2171_s13  ;;  %v1337_v52 = vsel %vm1305_vm3, %v1304_v37, %v4583_v35 }
 0x252   : > { %v3759_v62 = vpop.permute.xlu2 %1140  ;;  %v1370_v7 = vsel %vm1338_vm4, %v1337_v52, %v4584_v39 }
 0x253   : > { %v1003_v40 = vpop.permute.xlu1 %1002  ;;  %v1001_v8 = vpop.permute.xlu0 %1000  ;;  %v1403_v26 = vsel %vm1371_vm5, %v1370_v7, %v3305_v24  ;;  %v1453_v24 = vsel %vm1437_vm7, %v3339_v23, %v3655_v47  ;;  %v4587_v23 = vld [vmem:[#allocation75_spill] sm:$0xff]  ;;  %v4588_v47 = vld [vmem:[#allocation48_spill] sm:$0xff]  ;;  %v4590_v7 = vld [vmem:[#allocation106_spill] sm:$0xff] }
 0x254   : > { %v3766_v34 = vsel %vm1437_vm7, %v1414_v12, %v1003_v40  ;;  %v3769_v10 = vsel %vm1437_vm7, %v1413_v4, %v1001_v8  ;;  %v1436_v16 = vsel %vm1404_vm6, %v1403_v26, %v3659_v44  ;;  %v4585_v12 = vld [vmem:[#allocation34_spill] sm:$0xff]  ;;  %v2033_v4 = vld [vmem:[%s2252_s5 + $0x140] sm:$0xff] }
 0x258   : > { %1224 = vrot.lane.b32.xlu2 %v4579_v38, %s2171_s13 }
 0x259   : > { %1192 = vrot.lane.b32.xlu1 %v4580_v29, %s2171_s13  ;;  %1128 = vrot.lane.b32.xlu0 %v4581_v59, %s2170_s12 }
 0x25a   : > { %v3777_v11 = vpop.permute.xlu2 %1010 }
 0x25b   : > { %v1111_v21 = vpop.permute.xlu1 %1110  ;;  %v1047_v28 = vpop.permute.xlu0 %1046 }
 0x25c   : > { %v1469_v55 = vsel %vm1437_vm7, %v1436_v16, %v1047_v28  ;;  %v1486_v44 = vsel %vm1470_vm8, %v1453_v24, %v1111_v21  ;;  %v4589_v21 = vld [vmem:[#allocation94_spill] sm:$0xff]  ;;  %v4591_v16 = vld [vmem:[#allocation56_spill] sm:$0xff]  ;;  %v4594_v24 = vld [vmem:[#allocation155_spill] sm:$0xff] }
 0x25d   : > { %v1502_v29 = vsel %vm1470_vm8, %v1469_v55, %v3687_v17  ;;  %v1303_v35 = vsel %vm1272_vm2, %v3649_v42, %v4589_v21  ;;  %v4592_v55 = vld [vmem:[#allocation138_spill] sm:$0xff] }
 0x25e   : > { %v1336_v26 = vsel %vm1305_vm3, %v1303_v35, %v4590_v7 }
 0x260   : > { %1126 = vrot.lane.b32.xlu2 %v4585_v12, %s2170_s12  ;;  %v1369_v12 = vsel %vm1338_vm4, %v1336_v26, %v4592_v55 }
 0x261   : > { %1094 = vrot.lane.b32.xlu1 %v4586_v32, %s2170_s12  ;;  %1030 = vrot.lane.b32.xlu0 %v2033_v4, %s2169_s11  ;;  %v4593_v32 = vld [vmem:[#allocation104_spill] sm:$0xff] }
 0x262   : > { %v3800_v40 = vpop.permute.xlu2 %1138 }
 0x263   : > { %v1239_v8 = vpop.permute.xlu1 %1238  ;;  %v1207_v38 = vpop.permute.xlu0 %1206 }
 0x264   : > { %v1519_v59 = vsel %vm1503_vm9, %v1486_v44, %v1207_v38  ;;  %v1535_v14 = vsel %vm1503_vm9, %v1502_v29, %v1239_v8  ;;  %v1402_v44 = vsel %vm1371_vm5, %v1369_v12, %v4594_v24  ;;  %v4595_v8 = vld [vmem:[#allocation130_spill] sm:$0xff]  ;;  %v4596_v29 = vld [vmem:[#allocation60_spill] sm:$0xff] }
 0x265   : > { %v1552_v37 = vsel %vm1536_vm10, %v1519_v59, 0.0  ;;  %v1568_v28 = vsel %vm1536_vm10, %v1535_v14, 0.0  ;;  %v1435_v38 = vsel %vm1404_vm6, %v1402_v44, %v3472_v49  ;;  %v4597_v14 = vld [vmem:[#allocation49_spill] sm:$0xff] }
 0x266   : > { %1907 = vmatpush.xpose.msk.msra.mxu0 %vm1570_vm11, %v1552_v37  ;;  %1924 = vmatpush.xpose.msk.msra.mxu1 %vm1570_vm11, %v1568_v28  ;;  %v4598_v28 = vld [vmem:[#allocation29_spill] sm:$0xff] }
 0x267   : > { %v4603_v44 = vld [vmem:[#allocation105_spill] sm:$0xff] }
 0x268   : > { %1028 = vrot.lane.b32.xlu2 %v3540_v5, %s2169_s11  ;;  %v1287_v5 = vsel %vm1272_vm2, %v3604_v43, %v4591_v16 }
 0x269   : > { %1222 = vrot.lane.b32.xlu1 %v4587_v23, %s2171_s13  ;;  %1190 = vrot.lane.b32.xlu0 %v4588_v47, %s2171_s13  ;;  %v1320_v4 = vsel %vm1305_vm3, %v1287_v5, %v4593_v32  ;;  %v4599_v23 = vld [vmem:[#allocation15_spill] sm:$0xff]  ;;  %v2034_v32 = vld [vmem:[%s2252_s5 + $0x98] sm:$0xff] }
 0x26a   : > { %v3817_v17 = vpop.permute.xlu2 %1008  ;;  %v1353_v42 = vsel %vm1338_vm4, %v1320_v4, %v4595_v8  ;;  %v4602_v4 = vld [vmem:[#allocation73_spill] sm:$0xff] }
 0x26b   : > { %v1109_v52 = vpop.permute.xlu1 %1108  ;;  %v1045_v39 = vpop.permute.xlu0 %1044  ;;  %v1386_v59 = vsel %vm1371_vm5, %v1353_v42, %v4596_v29  ;;  %v1286_v24 = vsel %vm1272_vm2, %v2034_v32, %v4602_v4  ;;  %v4604_v42 = vld [vmem:[#allocation121_spill] sm:$0xff]  ;;  %v4605_v29 = vld [vmem:[#allocation147_spill] sm:$0xff] }
 0x26c   : > { %v1468_v43 = vsel %vm1437_vm7, %v1435_v38, %v1045_v39  ;;  %v1419_v37 = vsel %vm1404_vm6, %v1386_v59, %v3401_v6  ;;  %v1319_v8 = vsel %vm1305_vm3, %v1286_v24, %v4603_v44  ;;  %v4612_v4 = vld [vmem:[#allocation95_spill] sm:$0xff] }
 0x26d   : > { %v1452_v49 = vsel %vm1437_vm7, %v1419_v37, %v3723_v15  ;;  %v1501_v39 = vsel %vm1470_vm8, %v1468_v43, %v3759_v62  ;;  %v4600_v15 = vld [vmem:[#allocation16_spill] sm:$0xff]  ;;  %v1352_v38 = vsel %vm1338_vm4, %v1319_v8, %v4604_v42  ;;  %v4606_v43 = vld [vmem:[#allocation77_spill] sm:$0xff]  ;;  %v4607_v37 = vld [vmem:[#allocation43_spill] sm:$0xff] }
 0x26e   : > { %v1485_v21 = vsel %vm1470_vm8, %v1452_v49, %v1109_v52  ;;  %v4601_v62 = vld [vmem:[#allocation76_spill] sm:$0xff]  ;;  %v4613_v44 = vld [vmem:[#allocation127_spill] sm:$0xff] }
 0x26f   : > { %v4614_v42 = vld [vmem:[#allocation148_spill] sm:$0xff] }
 0x270   : > { %1188 = vrot.lane.b32.xlu2 %v4597_v14, %s2171_s13 }
 0x271   : > { %1124 = vrot.lane.b32.xlu1 %v4598_v28, %s2170_s12  ;;  %1092 = vrot.lane.b32.xlu0 %v4599_v23, %s2170_s12  ;;  %v4608_v28 = vld [vmem:[#allocation30_spill] sm:$0xff] }
 0x272   : > { %v1137_v47 = vpop.permute.xlu2 %1136 }
 0x273   : > { %v1237_v35 = vpop.permute.xlu1 %1236  ;;  %v1205_v7 = vpop.permute.xlu0 %1204 }
 0x274   : > { %v1534_v6 = vsel %vm1503_vm9, %v1501_v39, %v1237_v35  ;;  %v1518_v26 = vsel %vm1503_vm9, %v1485_v21, %v1205_v7 }
 0x275   : > { %v1551_v16 = vsel %vm1536_vm10, %v1518_v26, 0.0  ;;  %v1567_v5 = vsel %vm1536_vm10, %v1534_v6, 0.0 }
 0x276   : > { %1908 = vmatpush.xpose.msk.msra.mxu0 %vm1570_vm11, %v1551_v16  ;;  %1925 = vmatpush.xpose.msk.msra.mxu1 %vm1570_vm11, %v1567_v5  ;;  %v4610_v16 = vld [vmem:[#allocation11_spill] sm:$0xff] }
 0x278   : > { %1090 = vrot.lane.b32.xlu2 %v4600_v15, %s2170_s12 }
 0x279   : > { %1026 = vrot.lane.b32.xlu1 %v3546_v13, %s2169_s11  ;;  %1220 = vrot.lane.b32.xlu0 %v4601_v62, %s2171_s13  ;;  %v1385_v13 = vsel %vm1371_vm5, %v1352_v38, %v4605_v29 }
 0x27a   : > { %v3865_v52 = vpop.permute.xlu2 %1006  ;;  %v1418_v14 = vsel %vm1404_vm6, %v1385_v13, %v3406_v54 }
 0x27b   : > { %v1107_v55 = vpop.permute.xlu1 %1106  ;;  %v1043_v12 = vpop.permute.xlu0 %1042  ;;  %v1451_v23 = vsel %vm1437_vm7, %v1418_v14, %v3777_v11  ;;  %v4609_v11 = vld [vmem:[#allocation31_spill] sm:$0xff] }
 0x27c   : > { %v1467_v59 = vsel %vm1437_vm7, %v3632_v60, %v1043_v12  ;;  %v1484_v21 = vsel %vm1470_vm8, %v1451_v23, %v1107_v55  ;;  %v2036_v55 = vld [vmem:[%s2252_s5 + $0x90] sm:$0xff]  ;;  %v4611_v12 = vld [vmem:[#allocation74_spill] sm:$0xff] }
 0x27d   : > { %v1500_v35 = vsel %vm1470_vm8, %v1467_v59, %v3800_v40  ;;  %v2035_v40 = vld [vmem:[%s2252_s5 + $0x120] sm:$0xff]  ;;  %v1285_v32 = vsel %vm1272_vm2, %v2036_v55, %v4611_v12  ;;  %v4623_v12 = vld [vmem:[#allocation140_spill] sm:$0xff] }
 0x27e   : > { %v1318_v24 = vsel %vm1305_vm3, %v1285_v32, %v4612_v4  ;;  %v4615_v59 = vld [vmem:[#allocation69_spill] sm:$0xff] }
 0x27f   : > { %v1351_v8 = vsel %vm1338_vm4, %v1318_v24, %v4613_v44  ;;  %v4624_v24 = vld [vmem:[#allocation13_spill] sm:$0xff] }
 0x280   : > { %1218 = vrot.lane.b32.xlu2 %v4606_v43, %s2171_s13  ;;  %v1384_v38 = vsel %vm1371_vm5, %v1351_v8, %v4614_v42  ;;  %v4616_v43 = vld [vmem:[#allocation44_spill] sm:$0xff]  ;;  %v4625_v8 = vld [vmem:[#allocation70_spill] sm:$0xff] }
 0x281   : > { %1186 = vrot.lane.b32.xlu1 %v4607_v37, %s2171_s13  ;;  %1122 = vrot.lane.b32.xlu0 %v4608_v28, %s2170_s12  ;;  %v1417_v13 = vsel %vm1404_vm6, %v1384_v38, %v3314_v50 }
 0x282   : > { %v1135_v49 = vpop.permute.xlu2 %1134  ;;  %v1450_v14 = vsel %vm1437_vm7, %v1417_v13, %v3817_v17  ;;  %v4617_v17 = vld [vmem:[#allocation45_spill] sm:$0xff] }
 0x283   : > { %v1235_v60 = vpop.permute.xlu1 %1234  ;;  %v1203_v39 = vpop.permute.xlu0 %1202 }
 0x284   : > { %v1533_v54 = vsel %vm1503_vm9, %v1500_v35, %v1235_v60  ;;  %v1517_v7 = vsel %vm1503_vm9, %v1484_v21, %v1203_v39  ;;  %v4618_v39 = vld [vmem:[#allocation26_spill] sm:$0xff] }
 0x285   : > { %v1550_v6 = vsel %vm1536_vm10, %v1517_v7, 0.0  ;;  %v1566_v26 = vsel %vm1536_vm10, %v1533_v54, 0.0 }
 0x286   : > { %1909 = vmatpush.xpose.msk.msra.mxu0 %vm1570_vm11, %v1550_v6  ;;  %1926 = vmatpush.xpose.msk.msra.mxu1 %vm1570_vm11, %v1566_v26  ;;  %v2037_v26 = vld [vmem:[%s2252_s5 + $0x80] sm:$0xff] }
 0x288   : > { %1120 = vrot.lane.b32.xlu2 %v4609_v11, %s2170_s12  ;;  %v4620_v11 = vld [vmem:[#allocation50_spill] sm:$0xff] }
 0x289   : > { %1088 = vrot.lane.b32.xlu1 %v4610_v16, %s2170_s12  ;;  %1024 = vrot.lane.b32.xlu0 %v2035_v40, %s2169_s11  ;;  %v1284_v16 = vsel %vm1272_vm2, %v2037_v26, %v4620_v11  ;;  %v4621_v40 = vld [vmem:[#allocation102_spill] sm:$0xff]  ;;  %v4633_v11 = vld [vmem:[#allocation28_spill] sm:$0xff] }
 0x28a   : > { %v3903_v5 = vpop.permute.xlu2 %1004 }
 0x28b   : > { %v1105_v15 = vpop.permute.xlu1 %1104  ;;  %v1041_v62 = vpop.permute.xlu0 %1040 }
 0x28c   : > { %v1466_v29 = vsel %vm1437_vm7, %v3635_v27, %v1041_v62  ;;  %v1483_v28 = vsel %vm1470_vm8, %v1450_v14, %v1105_v15  ;;  %v1317_v15 = vsel %vm1305_vm3, %v1284_v16, %v4621_v40  ;;  %v4622_v62 = vld [vmem:[#allocation128_spill] sm:$0xff]  ;;  %v4634_v40 = vld [vmem:[#allocation10_spill] sm:$0xff] }
 0x28d   : > { %v1499_v23 = vsel %vm1470_vm8, %v1466_v29, %v1137_v47  ;;  %v4619_v47 = vld [vmem:[#allocation12_spill] sm:$0xff]  ;;  %v1350_v55 = vsel %vm1338_vm4, %v1317_v15, %v4622_v62 }
 0x28e   : > { %v1383_v32 = vsel %vm1371_vm5, %v1350_v55, %v4623_v12  ;;  %v2039_v15 = vld [vmem:[%s2252_s5 + $0xf8] sm:$0xff] }
 0x28f   : > { %v1416_v44 = vsel %vm1404_vm6, %v1383_v32, %v3379_v20 }
 0x290   : > { %1022 = vrot.lane.b32.xlu2 %v3490_v33, %s2169_s11  ;;  %v1449_v42 = vsel %vm1437_vm7, %v1416_v44, %v3865_v52  ;;  %v4626_v52 = vld [vmem:[#allocation71_spill] sm:$0xff] }
 0x291   : > { %1216 = vrot.lane.b32.xlu1 %v4615_v59, %s2171_s13  ;;  %1184 = vrot.lane.b32.xlu0 %v4616_v43, %s2171_s13 }
 0x292   : > { %v1133_v37 = vpop.permute.xlu2 %1132 }
 0x293   : > { %v1233_v27 = vpop.permute.xlu1 %1232  ;;  %v1201_v33 = vpop.permute.xlu0 %1200 }
 0x294   : > { %v1532_v21 = vsel %vm1503_vm9, %v1499_v23, %v1233_v27  ;;  %v1516_v50 = vsel %vm1503_vm9, %v1483_v28, %v1201_v33  ;;  %v4627_v28 = vld [vmem:[#allocation39_spill] sm:$0xff] }
 0x295   : > { %v1549_v60 = vsel %vm1536_vm10, %v1516_v50, 0.0  ;;  %v1565_v35 = vsel %vm1536_vm10, %v1532_v21, 0.0  ;;  %v2038_v21 = vld [vmem:[%s2252_s5 + $0x78] sm:$0xff]  ;;  %v4629_v50 = vld [vmem:[#allocation67_spill] sm:$0xff] }
 0x296   : > { %1910 = vmatpush.xpose.msk.msra.mxu0 %vm1570_vm11, %v1549_v60  ;;  %1927 = vmatpush.xpose.msk.msra.mxu1 %vm1570_vm11, %v1565_v35  ;;  %v1283_v60 = vsel %vm1272_vm2, %v2038_v21, %v4629_v50  ;;  %v4630_v35 = vld [vmem:[#allocation103_spill] sm:$0xff] }
 0x298   : > { %1182 = vrot.lane.b32.xlu2 %v4617_v17, %s2171_s13  ;;  %v1316_v17 = vsel %vm1305_vm3, %v1283_v60, %v4630_v35 }
 0x299   : > { %1118 = vrot.lane.b32.xlu1 %v4618_v39, %s2170_s12  ;;  %1086 = vrot.lane.b32.xlu0 %v4619_v47, %s2170_s12  ;;  %v4631_v39 = vld [vmem:[#allocation118_spill] sm:$0xff] }
 0x29a   : > { %v3940_v54 = vpop.permute.xlu2 %1034  ;;  %v1349_v47 = vsel %vm1338_vm4, %v1316_v17, %v4631_v39 }
 0x29b   : > { %v1103_v7 = vpop.permute.xlu1 %1102  ;;  %v1039_v6 = vpop.permute.xlu0 %1038 }
 0x29c   : > { %v1465_v4 = vsel %vm1437_vm7, %v3441_v22, %v1039_v6  ;;  %v1482_v29 = vsel %vm1470_vm8, %v1449_v42, %v1103_v7  ;;  %v4632_v7 = vld [vmem:[#allocation145_spill] sm:$0xff] }
 0x29d   : > { %v1498_v13 = vsel %vm1470_vm8, %v1465_v4, %v1135_v49  ;;  %v4628_v49 = vld [vmem:[#allocation27_spill] sm:$0xff]  ;;  %v1382_v6 = vsel %vm1371_vm5, %v1349_v47, %v4632_v7 }
 0x29e   : > { %v1415_v16 = vsel %vm1404_vm6, %v1382_v6, %v3384_v61 }
 0x29f   : > { %v1448_v62 = vsel %vm1437_vm7, %v1415_v16, %v3903_v5  ;;  %v4635_v5 = vld [vmem:[#allocation64_spill] sm:$0xff] }
 0x2a0   : > { %1084 = vrot.lane.b32.xlu2 %v4624_v24, %s2170_s12 }
 0x2a1   : > { %1020 = vrot.lane.b32.xlu1 %v3496_v3, %s2169_s11  ;;  %1214 = vrot.lane.b32.xlu0 %v4625_v8, %s2171_s13 }
 0x2a2   : > { %v1195_v38 = vpop.permute.xlu2 %1194 }
 0x2a3   : > { %v1231_v22 = vpop.permute.xlu1 %1230  ;;  %v1199_v59 = vpop.permute.xlu0 %1198 }
 0x2a4   : > { %v1531_v43 = vsel %vm1503_vm9, %v1498_v13, %v1231_v22  ;;  %v1515_v20 = vsel %vm1503_vm9, %v1482_v29, %v1199_v59 }
 0x2a5   : > { %v1548_v3 = vsel %vm1536_vm10, %v1515_v20, 0.0  ;;  %v1564_v14 = vsel %vm1536_vm10, %v1531_v43, 0.0  ;;  %v4638_v20 = vld [vmem:[#allocation23_spill] sm:$0xff] }
 0x2a6   : > { %1911 = vmatpush.xpose.msk.msra.mxu0 %vm1570_vm11, %v1548_v3  ;;  %1928 = vmatpush.xpose.msk.msra.mxu1 %vm1570_vm11, %v1564_v14  ;;  %v4639_v3 = vld [vmem:[#allocation9_spill] sm:$0xff]  ;;  %v1463_v14 = vsel %vm1437_vm7, %v3585_v19, %v3940_v54 }
 0x2a8   : > { %1212 = vrot.lane.b32.xlu2 %v4626_v52, %s2171_s13 }
 0x2a9   : > { %1180 = vrot.lane.b32.xlu1 %v4627_v28, %s2171_s13  ;;  %1116 = vrot.lane.b32.xlu0 %v4628_v49, %s2170_s12 }
 0x2aa   : > { %v1097_v27 = vpop.permute.xlu2 %1096 }
 0x2ab   : > { %v1101_v23 = vpop.permute.xlu1 %1100  ;;  %v1037_v33 = vpop.permute.xlu0 %1036  ;;  %v1479_v21 = vsel %vm1470_vm8, %v3769_v10, %v1097_v27 }
 0x2ac   : > { %v1464_v26 = vsel %vm1437_vm7, %v3582_v58, %v1037_v33  ;;  %v1481_v12 = vsel %vm1470_vm8, %v1448_v62, %v1101_v23  ;;  %v4640_v33 = vld [vmem:[#allocation65_spill] sm:$0xff] }
 0x2ad   : > { %v1497_v58 = vsel %vm1470_vm8, %v1464_v26, %v1133_v37  ;;  %v4636_v37 = vld [vmem:[#allocation40_spill] sm:$0xff] }
 0x2b0   : > { %1114 = vrot.lane.b32.xlu2 %v4633_v11, %s2170_s12 }
 0x2b1   : > { %1082 = vrot.lane.b32.xlu1 %v4634_v40, %s2170_s12  ;;  %1018 = vrot.lane.b32.xlu0 %v2039_v15, %s2169_s11 }
 0x2b2   : > { %v1225_v55 = vpop.permute.xlu2 %1224 }
 0x2b3   : > { %v1229_v32 = vpop.permute.xlu1 %1228  ;;  %v1197_v4 = vpop.permute.xlu0 %1196 }
 0x2b4   : > { %v1530_v24 = vsel %vm1503_vm9, %v1497_v58, %v1229_v32  ;;  %v1514_v61 = vsel %vm1503_vm9, %v1481_v12, %v1197_v4 }
 0x2b5   : > { %v1547_v44 = vsel %vm1536_vm10, %v1514_v61, 0.0  ;;  %v1563_v8 = vsel %vm1536_vm10, %v1530_v24, 0.0 }
 0x2b6   : > { %1912 = vmatpush.xpose.msk.msra.mxu0 %vm1570_vm11, %v1547_v44  ;;  %1929 = vmatpush.xpose.msk.msra.mxu1 %vm1570_vm11, %v1563_v8 }
 0x2b8   : > { %1016 = vrot.lane.b32.xlu2 %v3450_v0, %s2169_s11  ;;  %v4637_v0 = vld [vmem:[#allocation41_spill] sm:$0xff]  ;;  %s2056_s11 = scalar_lea.hbm %s2055_s10, 16 }
 0x2b9   : > { %1210 = vrot.lane.b32.xlu1 %v4635_v5, %s2171_s13  ;;  %1178 = vrot.lane.b32.xlu0 %v4636_v37, %s2171_s13  ;;  %p2057_p11 = scmp.ne.s32.totalorder %s2055_s10, %s2056_s11  ;;  %p2062_p1 = scmp.lt.s32.totalorder %s2060_s14, %s2056_s11 }
 0x2ba   : > { %v1127_v22 = vpop.permute.xlu2 %1126 }
 0x2bb   : > { %v1131_v42 = vpop.permute.xlu1 %1130  ;;  %v1099_v29 = vpop.permute.xlu0 %1098  ;;  %p2058_p12 = pnand %p2057_p11, %p2237_p5  ;;  %p2063_p2 = por %p2062_p1, %p2061_p0 }
 0x2bc   : > { %v1480_v13 = vsel %vm1470_vm8, %v3766_v34, %v1099_v29  ;;  %v1496_v34 = vsel %vm1470_vm8, %v1463_v14, %v1131_v42 }
 0x2bd   : > { %v1513_v59 = vsel %vm1503_vm9, %v1480_v13, %v1195_v38  ;;  %p2059_p13 = pneg %p2058_p12 }
 0x2be   : > { %v1546_v43 = vsel %vm1536_vm10, %v1513_v59, 0.0 }
 0x2bf   : > { %1913 = vmatpush.xpose.msk.msra.mxu0 %vm1570_vm11, %v1546_v43  ;;  %p2064_p3 = pnand %p2063_p2, %p2059_p13 }
 0x2c0   : > { %1176 = vrot.lane.b32.xlu2 %v4637_v0, %s2171_s13 }
 0x2c1   : > { %1112 = vrot.lane.b32.xlu1 %v4638_v20, %s2170_s12  ;;  %1080 = vrot.lane.b32.xlu0 %v4639_v3, %s2170_s12 }
 0x2c2   : > { %v1029_v23 = vpop.permute.xlu2 %1028 }
 0x2c3   : > { %v1033_v38 = vpop.permute.xlu1 %1032  ;;  %v1227_v52 = vpop.permute.xlu0 %1226  ;;  %v1460_v61 = vsel %vm1437_vm7, %v3532_v41, %v1029_v23 }
 0x2c4   : > { %v1529_v28 = vsel %vm1503_vm9, %v1496_v34, %v1227_v52  ;;  %v1462_v19 = vsel %vm1437_vm7, %v3404_v53, %v1033_v38 }
 0x2c5   : > { %v1562_v49 = vsel %vm1536_vm10, %v1529_v28, 0.0 }
 0x2c6   : > { %1930 = vmatpush.xpose.msk.msra.mxu1 %vm1570_vm11, %v1562_v49 }
 0x2c9   : > { %1208 = vrot.lane.b32.xlu0 %v4640_v33, %s2171_s13 }
 0x2ca   : > { %v1189_v10 = vpop.permute.xlu2 %1188 }
 0x2cb   : > { %v1193_v54 = vpop.permute.xlu1 %1192  ;;  %v1129_v50 = vpop.permute.xlu0 %1128 }
 0x2cc   : > { %v1512_v60 = vsel %vm1503_vm9, %v1479_v21, %v1193_v54  ;;  %v1495_v35 = vsel %vm1470_vm8, %v1462_v19, %v1129_v50 }
 0x2cd   : > { %v1545_v17 = vsel %vm1536_vm10, %v1512_v60, 0.0  ;;  %v1528_v39 = vsel %vm1503_vm9, %v1495_v35, %v1225_v55 }
 0x2ce   : > { %1914 = vmatpush.xpose.msk.msra.mxu0 %vm1570_vm11, %v1545_v17  ;;  %v1561_v47 = vsel %vm1536_vm10, %v1528_v39, 0.0 }
 0x2cf   : > { %1931 = vmatpush.xpose.msk.msra.mxu1 %vm1570_vm11, %v1561_v47 }
 0x2d2   : > { %v1091_v6 = vpop.permute.xlu2 %1090 }
 0x2d3   : > { %v1095_v27 = vpop.permute.xlu1 %1094  ;;  %v1031_v7 = vpop.permute.xlu0 %1030 }
 0x2d4   : > { %v1461_v53 = vsel %vm1437_vm7, %v3529_v51, %v1031_v7  ;;  %v1478_v26 = vsel %vm1470_vm8, %v3629_v25, %v1095_v27 }
 0x2d5   : > { %v1494_v16 = vsel %vm1470_vm8, %v1461_v53, %v1127_v22 }
 0x2da   : > { %v1219_v58 = vpop.permute.xlu2 %1218 }
 0x2db   : > { %v1223_v11 = vpop.permute.xlu1 %1222  ;;  %v1191_v40 = vpop.permute.xlu0 %1190 }
 0x2dc   : > { %v1527_v15 = vsel %vm1503_vm9, %v1494_v16, %v1223_v11  ;;  %v1511_v62 = vsel %vm1503_vm9, %v1478_v26, %v1191_v40 }
 0x2dd   : > { %v1544_v55 = vsel %vm1536_vm10, %v1511_v62, 0.0  ;;  %v1560_v12 = vsel %vm1536_vm10, %v1527_v15, 0.0 }
 0x2de   : > { %1915 = vmatpush.xpose.msk.msra.mxu0 %vm1570_vm11, %v1544_v55  ;;  %1932 = vmatpush.xpose.msk.msra.mxu1 %vm1570_vm11, %v1560_v12 }
 0x2e2   : > { %v1121_v29 = vpop.permute.xlu2 %1120 }
 0x2e3   : > { %v1125_v51 = vpop.permute.xlu1 %1124  ;;  %v1093_v32 = vpop.permute.xlu0 %1092 }
 0x2e4   : > { %v1477_v25 = vsel %vm1470_vm8, %v3730_v57, %v1093_v32  ;;  %v1493_v44 = vsel %vm1470_vm8, %v1460_v61, %v1125_v51  ;;  %v1476_v57 = vsel %vm1470_vm8, %v3733_v1, %v1091_v6 }
 0x2e5   : > { %v1510_v4 = vsel %vm1503_vm9, %v1477_v25, %v1189_v10 }
 0x2e6   : > { %v1543_v24 = vsel %vm1536_vm10, %v1510_v4, 0.0 }
 0x2e7   : > { %1916 = vmatpush.xpose.msk.msra.mxu0 %vm1570_vm11, %v1543_v24 }
 0x2ea   : > { %v1023_v1 = vpop.permute.xlu2 %1022 }
 0x2eb   : > { %v1027_v8 = vpop.permute.xlu1 %1026  ;;  %v1221_v5 = vpop.permute.xlu0 %1220  ;;  %v1457_v39 = vsel %vm1437_vm7, %v3482_v56, %v1023_v1 }
 0x2ec   : > { %v1526_v37 = vsel %vm1503_vm9, %v1493_v44, %v1221_v5  ;;  %v1459_v22 = vsel %vm1437_vm7, %v3382_v18, %v1027_v8 }
 0x2ed   : > { %v1559_v42 = vsel %vm1536_vm10, %v1526_v37, 0.0 }
 0x2ee   : > { %1933 = vmatpush.xpose.msk.msra.mxu1 %vm1570_vm11, %v1559_v42 }
 0x2f2   : > { %v1183_v38 = vpop.permute.xlu2 %1182 }
 0x2f3   : > { %v1187_v13 = vpop.permute.xlu1 %1186  ;;  %v1123_v59 = vpop.permute.xlu0 %1122 }
 0x2f4   : > { %v1509_v41 = vsel %vm1503_vm9, %v1476_v57, %v1187_v13  ;;  %v1492_v43 = vsel %vm1470_vm8, %v1459_v22, %v1123_v59  ;;  %v1569_v57 = vld [vmem:[%s4211_s1] sm:$0xff] }
 0x2f5   : > { %v1542_v0 = vsel %vm1536_vm10, %v1509_v41, 0.0  ;;  %v1525_v20 = vsel %vm1503_vm9, %v1492_v43, %v1219_v58 }
 0x2f6   : > { %1917 = vmatpush.xpose.msk.msra.mxu0 %vm1570_vm11, %v1542_v0  ;;  %v1558_v3 = vsel %vm1536_vm10, %v1525_v20, 0.0 }
 0x2f7   : > { %1934 = vmatpush.xpose.msk.msra.mxu1 %vm1570_vm11, %v1558_v3 }
 0x2fa   : > { %v1085_v60 = vpop.permute.xlu2 %1084 }
 0x2fb   : > { %v1089_v14 = vpop.permute.xlu1 %1088  ;;  %v1025_v34 = vpop.permute.xlu0 %1024 }
 0x2fc   : > { %v1458_v18 = vsel %vm1437_vm7, %v3479_v48, %v1025_v34  ;;  %v1475_v52 = vsel %vm1470_vm8, %v3579_v63, %v1089_v14 }
 0x2fd   : > { %v1491_v49 = vsel %vm1470_vm8, %v1458_v18, %v1121_v29 }
 0x302   : > { %v1213_v6 = vpop.permute.xlu2 %1212 }
 0x303   : > { %v1217_v28 = vpop.permute.xlu1 %1216  ;;  %v1185_v23 = vpop.permute.xlu0 %1184 }
 0x304   : > { %v1524_v33 = vsel %vm1503_vm9, %v1491_v49, %v1217_v28  ;;  %v1508_v21 = vsel %vm1503_vm9, %v1475_v52, %v1185_v23 }
 0x305   : > { %v1541_v19 = vsel %vm1536_vm10, %v1508_v21, 0.0  ;;  %v1557_v54 = vsel %vm1536_vm10, %v1524_v33, 0.0 }
 0x306   : > { %1918 = vmatpush.xpose.msk.msra.mxu0 %vm1570_vm11, %v1541_v19  ;;  %1935 = vmatpush.xpose.msk.msra.mxu1 %vm1570_vm11, %v1557_v54 }
 0x30b   : > { %v1119_v48 = vpop.permute.xlu1 %1118  ;;  %v1087_v50 = vpop.permute.xlu0 %1086 }
 0x30c   : > { %v1474_v63 = vsel %vm1470_vm8, %v3694_v36, %v1087_v50  ;;  %v1490_v47 = vsel %vm1470_vm8, %v1457_v39, %v1119_v48  ;;  %v1473_v36 = vsel %vm1470_vm8, %v3697_v9, %v1085_v60  ;;  %v1115_v9 = vpop.permute.xlu2 %1114 }
 0x30d   : > { %v1507_v35 = vsel %vm1503_vm9, %v1474_v63, %v1183_v38 }
 0x30e   : > { %v1540_v17 = vsel %vm1536_vm10, %v1507_v35, 0.0 }
 0x30f   : > { %1919 = vmatpush.xpose.msk.msra.mxu0 %vm1570_vm11, %v1540_v17 }
 0x313   : > { %v1021_v10 = vpop.permute.xlu1 %1020  ;;  %v1215_v27 = vpop.permute.xlu0 %1214 }
 0x314   : > { %v1523_v7 = vsel %vm1503_vm9, %v1490_v47, %v1215_v27  ;;  %v1456_v26 = vsel %vm1437_vm7, %v3360_v30, %v1021_v10  ;;  %v1017_v32 = vpop.permute.xlu2 %1016 }
 0x315   : > { %v1556_v53 = vsel %vm1536_vm10, %v1523_v7, 0.0  ;;  %v1454_v13 = vsel %vm1437_vm7, %v3447_v46, %v1017_v32 }
 0x316   : > { %1936 = vmatpush.xpose.msk.msra.mxu1 %vm1570_vm11, %v1556_v53 }
 0x31b   : > { %v1181_v11 = vpop.permute.xlu1 %1180  ;;  %v1117_v16 = vpop.permute.xlu0 %1116 }
 0x31c   : > { %v1506_v56 = vsel %vm1503_vm9, %v1473_v36, %v1181_v11  ;;  %v1489_v40 = vsel %vm1470_vm8, %v1456_v26, %v1117_v16 }
 0x31d   : > { %v1539_v15 = vsel %vm1536_vm10, %v1506_v56, 0.0  ;;  %v1522_v62 = vsel %vm1503_vm9, %v1489_v40, %v1213_v6 }
 0x31e   : > { %1920 = vmatpush.xpose.msk.msra.mxu0 %vm1570_vm11, %v1539_v15  ;;  %v1555_v55 = vsel %vm1536_vm10, %v1522_v62, 0.0 }
 0x31f   : > { %1937 = vmatpush.xpose.msk.msra.mxu1 %vm1570_vm11, %v1555_v55 }
 0x323   : > { %v1083_v12 = vpop.permute.xlu1 %1082  ;;  %v1019_v51 = vpop.permute.xlu0 %1018 }
 0x324   : > { %v1455_v30 = vsel %vm1437_vm7, %v3444_v31, %v1019_v51  ;;  %v1472_v58 = vsel %vm1470_vm8, %v3526_v2, %v1083_v12  ;;  %v1177_v31 = vpop.permute.xlu2 %1176 }
 0x325   : > { %v1488_v4 = vsel %vm1470_vm8, %v1455_v30, %v1115_v9 }
 0x32b   : > { %v1211_v25 = vpop.permute.xlu1 %1210  ;;  %v1179_v24 = vpop.permute.xlu0 %1178 }
 0x32c   : > { %v1521_v61 = vsel %vm1503_vm9, %v1488_v4, %v1211_v25  ;;  %v1505_v44 = vsel %vm1503_vm9, %v1472_v58, %v1179_v24 }
 0x32d   : > { %v1538_v8 = vsel %vm1536_vm10, %v1505_v44, 0.0  ;;  %v1554_v5 = vsel %vm1536_vm10, %v1521_v61, 0.0 }
 0x32e   : > { %1921 = vmatpush.xpose.msk.msra.mxu0 %vm1570_vm11, %v1538_v8  ;;  %1938 = vmatpush.xpose.msk.msra.mxu1 %vm1570_vm11, %v1554_v5 }
 0x333   : > { %v1081_v37 = vpop.permute.xlu0 %1080  ;;  %v1113_v22 = vpop.permute.xlu1 %1112 }
 0x334   : > { %v1471_v2 = vsel %vm1470_vm8, %v3662_v45, %v1081_v37  ;;  %v1487_v59 = vsel %vm1470_vm8, %v1454_v13, %v1113_v22 }
 0x335   : > { %v1504_v42 = vsel %vm1503_vm9, %v1471_v2, %v1177_v31 }
 0x336   : > { %v1537_v29 = vsel %vm1536_vm10, %v1504_v42, 0.0 }
 0x337   : > { %1922 = vmatpush.xpose.msk.msra.mxu0 %vm1570_vm11, %v1537_v29 }
 0x33a   : > { %1923 = vmatmul.msk.f32.vlgmr.msra.gmra.mxu0 %vm1570_vm11, %v1569_v57 }
 0x33b   : > { %v1209_v45 = vpop.permute.xlu0 %1208 }
 0x33c   : > { %v1520_v41 = vsel %vm1503_vm9, %v1487_v59, %v1209_v45 }
 0x33d   : > { %v1553_v43 = vsel %vm1536_vm10, %v1520_v41, 0.0 }
 0x33e   : > { %1939 = vmatpush.xpose.msk.msra.mxu1 %vm1570_vm11, %v1553_v43 }
 0x341   : > { %1940 = vmatmul.msk.f32.vlgmr.msra.gmra.mxu1 %vm1570_vm11, %v1569_v57 }
 0x3b7   : > { %v1687_v0 = vpop.f32.mrf.mxu0 }
 0x3b8   : > { %1710 = vst [vmem:[%s194_s28] sm:$0xff] %v1687_v0  ;;  %v1715_v46 = vmul.f32 %v1687_v0, %v1687_v0 }
 0x3be   : > { %v1707_v20 = vpop.f32.mrf.mxu1 }
 0x3bf   : > { %1711 = vst [vmem:[%s194_s28 + $0x8] sm:$0xff] %v1707_v20  ;;  %v1712_v3 = vadd.f32 %v1707_v20, %v1687_v0  ;;  %v1716_v1 = vmul.f32 %v1707_v20, %v1707_v20 }
 0x3c0   : > { %2067 = shalt.err (!%p2064_p3)
}
 0x3c1   : > { %1952 = dma.vmem_to_hbm [thread:$0]  (%p2237_p5), %s1747_s7, 256, %s1749_s8, %s1723_s9   ;;  %v1717_v14 = vadd.f32 %v1716_v1, %v1715_v46  ;;  %1713 = vadd.xlane.f32.xlu1 %v1712_v3 }
 0x3c2   : > { %s1904_s28 = sshll.u32 %s4137_s23, 3  ;;  %s1946_s29 = sshll.u32 %s2218_s19, 3 }
 0x3c3   : > { %1718 = vadd.xlane.f32.xlu2 %v1717_v14  ;;  %s1758_s6 = scalar_lea.hbm %s4213_s3, %s1946_s29  ;;  %s201_s10 = scalar_lea.vmem [#allocation4], %s1904_s28 }
 0x3c4   : > { %s1760_s11 = sshll.u32 %s201_s10, 4  ;;  %s1772_s14 = scalar_lea.hbm %s4214_s4, %s1946_s29  ;;  %s1761_s11 = int_to_ptr.vmem [resolvable:$true] %s1760_s11 }
 0x3c5   : > { %s1727_s22 = sand.u32 1, %s2218_s19   ;;  %s1762_s27 = sshll.u32 %s1758_s6, 4  ;;  %s1763_s27 = int_to_ptr.hbm [resolvable:$true] %s1762_s27 }
 0x3c6   : > { %s208_s7 = scalar_lea.vmem [#allocation6], %s1904_s28  ;;  %s1776_s9 = sshll.u32 %s1772_s14, 4  ;;  %s4166_s9 = int_to_ptr.hbm [resolvable:$true] %s1776_s9 }
 0x3c7   : > { %s1774_s8 = sshll.u32 %s208_s7, 4  ;;  %s1728_s23 = scalar_lea.sflag [#allocation5], %s1727_s22  ;;  %s4164_s8 = int_to_ptr.vmem [resolvable:$true] %s1774_s8 }
 0x3c8   : > { %s2082_s30 = sshra.s32 %s1763_s27, 4  ;;  %s2088_s29 = scalar_lea.hbm %s4213_s3, 16  ;;  %s2083_s30 = int_to_ptr.hbm [resolvable:$true] %s2082_s30 }
 0x3c9   : > { %s2084_s5 = scalar_lea.hbm %s2083_s30, 8  ;;  %p2089_p9 = scmp.lt.s32.totalorder %s2083_s30, %s4213_s3 }
 0x3ca   : > { %p2085_p4 = scmp.ne.s32.totalorder %s2083_s30, %s2084_s5  ;;  %p2090_p10 = scmp.lt.s32.totalorder %s2088_s29, %s2084_s5 }
 0x3cc   : > { %p2086_p7 = pnand %p2085_p4, %p2237_p5  ;;  %p2091_p11 = por %p2090_p10, %p2089_p9 }
 0x3ce   : > { %p2087_p8 = pneg %p2086_p7 }
 0x3d0   : > { %p2092_p12 = pnand %p2091_p11, %p2087_p8 }
 0x434   : > { %v1714_v34 = vpop.xlane.xlu1 %1713 }
 0x435   : > { %1720 = vst [vmem:[%s201_s10] sm:$0xff] %v1714_v34 }
 0x436   : > { %v1719_v18 = vpop.xlane.xlu2 %1718 }
 0x437   : > { %2095 = shalt.err (!%p2092_p12)
}
 0x438   : > { %1953 = dma.vmem_to_hbm [thread:$0]  (%p2237_p5), %s1761_s11, 128, %s1763_s27, %s1728_s23   ;;  %1721 = vst [vmem:[%s208_s7] sm:$0xff] %v1719_v18 }
 0x439   : > { %s2110_s10 = sshra.s32 %s4166_s9, 4  ;;  %s2116_s30 = scalar_lea.hbm %s4214_s4, 16  ;;  %s2111_s10 = int_to_ptr.hbm [resolvable:$true] %s2110_s10 }
 0x43a   : > { %s2112_s13 = scalar_lea.hbm %s2111_s10, 8  ;;  %p2117_p2 = scmp.lt.s32.totalorder %s2111_s10, %s4214_s4 }
 0x43b   : > { %p2113_p13 = scmp.ne.s32.totalorder %s2111_s10, %s2112_s13  ;;  %p2118_p3 = scmp.lt.s32.totalorder %s2116_s30, %s2112_s13 }
 0x43d   : > { %p2114_p0 = pnand %p2113_p13, %p2237_p5  ;;  %p2119_p4 = por %p2118_p3, %p2117_p2 }
 0x43f   : > { %p2115_p1 = pneg %p2114_p0 }
 0x441   : > { %p2120_p7 = pnand %p2119_p4, %p2115_p1 }
 0x443   : > { %2123 = shalt.err (!%p2120_p7)
}
 0x444   : > { %1954 = dma.vmem_to_hbm [thread:$0]  (%p2237_p5), %s4164_s8, 128, %s4166_s9, %s1728_s23  }
 0x445 PF: > { %p1968_p8 = scmp.ge.s32.totalorder %s2162_s18, 2  ;;  %s1788_s11 = sand.u32 1, %s2150_s15  }
 0x446   : > { %s1789_s27 = scalar_lea.sflag [#allocation3], %s1788_s11 }
 0x447   : > { %p1959_p9 = pnand %p1968_p8, %p2241_p6 }
 0x449   : > { %p1960_p10 = pneg %p1959_p9 }
 0x44b   : > { %2141 = dma.done.wait (%p1960_p10), %s1789_s27, 256  }
 0x44c   : > { %2143 = vsyncadd (%p1960_p10), %s1789_s27, 4294967040  ;;  %s1798_s7 = sand.u32 1, %s1899_s20  }
 0x44d   : > { %s1799_s28 = scalar_lea.sflag [#allocation5], %s1798_s7 }
 0x44e   : > { %2145 = dma.done.wait (%p1960_p10), %s1799_s28, 256  }
 0x44f   : > { %2147 = vsyncadd (%p1960_p10), %s1799_s28, 4294967040  ;;  %p18_p5 = scmp.ge.s32.totalorder %s2222_s21, 4   ;;  %s4641_s15 = smov %s2154_s16 }
 0x450   : > { %s4642_s16 = smov %s2158_s17  ;;  %s4643_s17 = smov %s2235_s24 }
 0x451   : > { %s4644_s18 = smov %s2222_s21  ;;  %20 = sbr.rel (!%p18_p5) target bundleno = 5 (0x5), region = 95 }
 0x456   :  { %1815 = vsyncpa [#allocation3], 1 }
 0x457   :  { %1817 = vsyncpa [#allocation3 + $0x1], 1 }
 0x458   :  { %1818 = vsyncpa [#allocation5], 1 }
 0x459   :  { %1820 = vsyncpa [#allocation5 + $0x1], 1 }

</bundles_post_ra>
